<compile_context>
chip_gen: v5e
topology: v5e:2x2
jax: 0.10.0
libtpu: 0.0.40
codegen_flags: <defaults>
</compile_context>

<pallas_src>
import functools

import jax
import jax.numpy as jnp
from jax.experimental import pallas as pl
from jax.experimental.pallas import tpu as pltpu


_VMEM_LIMIT = 64 * 1024 * 1024   # safe on v5e/v6e (128 MiB) and v7x (64 MiB)


# ----------------------------------------------------------------------------
# helpers
# ----------------------------------------------------------------------------

def _tile(dim, target):
    """Largest 128-friendly tile <= target that evenly divides dim."""
    if dim <= target:
        return dim
    for t in (target, 512, 384, 256, 128, 64):
        if t <= target and dim % t == 0:
            return t
    return dim


# ----------------------------------------------------------------------------
# Tiled linear (+ optional activation) kernel — bf16 operands, f32 accumulator
# ----------------------------------------------------------------------------

def _matmul_kernel(act, x_ref, w_ref, b_ref, o_ref, acc_ref):
    @pl.when(pl.program_id(2) == 0)
    def _():
        acc_ref[...] = jnp.zeros_like(acc_ref)

    acc_ref[...] += jnp.dot(x_ref[...], w_ref[...],
                            preferred_element_type=jnp.float32)

    @pl.when(pl.program_id(2) == pl.num_programs(2) - 1)
    def _():
        y = acc_ref[...] + b_ref[...]
        if act == "gelu":
            # TODO(synk): PyTorch nn.GELU() is exact-erf; tanh approx used here
            # (erf has no guaranteed Mosaic lowering).
            y = jax.nn.gelu(y)
        elif act == "tanh":
            y = jnp.tanh(y)
        o_ref[...] = y.astype(o_ref.dtype)


def linear(x, w, b, act="none", out_dtype=jnp.bfloat16, tm=512, tn=512, tk=512):
    M, K = x.shape
    _, N = w.shape
    tm, tn, tk = _tile(M, tm), _tile(N, tn), _tile(K, tk)
    return pl.pallas_call(
        functools.partial(_matmul_kernel, act),
        grid_spec=pltpu.PrefetchScalarGridSpec(
            num_scalar_prefetch=0,
            grid=(M // tm, N // tn, K // tk),
            in_specs=[
                pl.BlockSpec((tm, tk), lambda i, j, k: (i, k)),
                pl.BlockSpec((tk, tn), lambda i, j, k: (k, j)),
                pl.BlockSpec((1, tn), lambda i, j, k: (0, j)),
            ],
            out_specs=pl.BlockSpec((tm, tn), lambda i, j, k: (i, j)),
            scratch_shapes=[pltpu.VMEM((tm, tn), jnp.float32)],
        ),
        out_shape=jax.ShapeDtypeStruct((M, N), out_dtype),
        compiler_params=pltpu.CompilerParams(
            dimension_semantics=("parallel", "parallel", "arbitrary"),
            vmem_limit_bytes=_VMEM_LIMIT),
    )(x, w, b.reshape(1, N))


# ----------------------------------------------------------------------------
# Tiled linear + residual add + layernorm (fused epilogue)
# ----------------------------------------------------------------------------

def _matmul_res_ln_kernel(eps, x_ref, w_ref, b_ref, r_ref, g_ref, beta_ref,
                          o_ref, acc_ref):
    @pl.when(pl.program_id(1) == 0)
    def _():
        acc_ref[...] = jnp.zeros_like(acc_ref)

    acc_ref[...] += jnp.dot(x_ref[...], w_ref[...],
                            preferred_element_type=jnp.float32)

    @pl.when(pl.program_id(1) == pl.num_programs(1) - 1)
    def _():
        y = acc_ref[...] + b_ref[...] + r_ref[...].astype(jnp.float32)
        mu = jnp.mean(y, axis=-1, keepdims=True)
        var = jnp.mean(jnp.square(y - mu), axis=-1, keepdims=True)
        o_ref[...] = ((y - mu) * jax.lax.rsqrt(var + eps) * g_ref[...]
                      + beta_ref[...]).astype(o_ref.dtype)


def linear_residual_layernorm(x, w, b, residual, g, beta,
                              tm=512, tk=512, eps=1e-12,
                              out_dtype=jnp.bfloat16):
    M, K = x.shape
    _, N = w.shape          # layernorm is over the full output row -> full N block
    tm, tk = _tile(M, tm), _tile(K, tk)
    return pl.pallas_call(
        functools.partial(_matmul_res_ln_kernel, eps),
        grid_spec=pltpu.PrefetchScalarGridSpec(
            num_scalar_prefetch=0,
            grid=(M // tm, K // tk),
            in_specs=[
                pl.BlockSpec((tm, tk), lambda i, k: (i, k)),
                pl.BlockSpec((tk, N), lambda i, k: (k, 0)),
                pl.BlockSpec((1, N), lambda i, k: (0, 0)),
                pl.BlockSpec((tm, N), lambda i, k: (i, 0)),
                pl.BlockSpec((1, N), lambda i, k: (0, 0)),
                pl.BlockSpec((1, N), lambda i, k: (0, 0)),
            ],
            out_specs=pl.BlockSpec((tm, N), lambda i, k: (i, 0)),
            scratch_shapes=[pltpu.VMEM((tm, N), jnp.float32)],
        ),
        out_shape=jax.ShapeDtypeStruct((M, N), out_dtype),
        compiler_params=pltpu.CompilerParams(
            dimension_semantics=("parallel", "arbitrary"),
            vmem_limit_bytes=_VMEM_LIMIT),
    )(x, w, b.reshape(1, N), residual, g.reshape(1, N), beta.reshape(1, N))


# ----------------------------------------------------------------------------
# Fused embedding-sum (word + pos + type) + layernorm
# ----------------------------------------------------------------------------

def _embed_ln_kernel(eps, w_ref, t_ref, p_ref, g_ref, b_ref, o_ref):
    x = (w_ref[0].astype(jnp.float32)
         + t_ref[0].astype(jnp.float32)
         + p_ref[...].astype(jnp.float32))
    mu = jnp.mean(x, axis=-1, keepdims=True)
    var = jnp.mean(jnp.square(x - mu), axis=-1, keepdims=True)
    o_ref[0] = ((x - mu) * jax.lax.rsqrt(var + eps) * g_ref[...]
                + b_ref[...]).astype(o_ref.dtype)


def embed_layernorm(word, typ, pos, g, b, ts=512, eps=1e-12,
                    out_dtype=jnp.bfloat16):
    B, S, H = word.shape
    ts = _tile(S, ts)
    return pl.pallas_call(
        functools.partial(_embed_ln_kernel, eps),
        grid=(B, S // ts),
        in_specs=[
            pl.BlockSpec((1, ts, H), lambda bi, si: (bi, si, 0)),
            pl.BlockSpec((1, ts, H), lambda bi, si: (bi, si, 0)),
            pl.BlockSpec((ts, H), lambda bi, si: (si, 0)),
            pl.BlockSpec((1, H), lambda bi, si: (0, 0)),
            pl.BlockSpec((1, H), lambda bi, si: (0, 0)),
        ],
        out_specs=pl.BlockSpec((1, ts, H), lambda bi, si: (bi, si, 0)),
        out_shape=jax.ShapeDtypeStruct((B, S, H), out_dtype),
        compiler_params=pltpu.CompilerParams(
            dimension_semantics=("parallel", "parallel"),
            vmem_limit_bytes=_VMEM_LIMIT),
    )(word, typ, pos, g.reshape(1, H), b.reshape(1, H))


# ----------------------------------------------------------------------------
# Multi-head self-attention with fused mask bias (valid_length in SMEM)
#   grid = (batch, query-row tile); K/V slab resident across query tiles.
# ----------------------------------------------------------------------------

def _attention_kernel(num_heads, scale, vl_ref, q_ref, kv_ref, o_ref):
    # q_ref block: (1, tq, 3H) bf16 (only the first H columns are used)
    # kv_ref block: (1, S, 3H) bf16 (full key/value slab for this batch element)
    b = pl.program_id(0)
    S = kv_ref.shape[1]
    H = kv_ref.shape[2] // 3
    Dh = H // num_heads

    # gen_attention_mask folded in: key positions >= valid_length get -1e9 bias.
    vl = vl_ref[b]
    col = jax.lax.broadcasted_iota(jnp.int32, (1, S), 1)
    bias = jnp.where(col < vl, 0.0, -1e9).astype(jnp.float32)      # (1, S)

    # TODO(synk): pack >=2 heads per MXU matmul (>=128-wide contraction) once a
    # lane-aligned head-major layout is available; Dh < 128 keeps this per-head.
    # TODO(synk): flash-style online-softmax KV tiling for very long sequences.
    for h in range(num_heads):          # each head stores its slice directly
        q = q_ref[0, :, h * Dh:(h + 1) * Dh]
        k = kv_ref[0, :, H + h * Dh:H + (h + 1) * Dh]
        v = kv_ref[0, :, 2 * H + h * Dh:2 * H + (h + 1) * Dh]
        # QK^T via dot_general contracting the last axes (no explicit k.T)
        s = jax.lax.dot_general(q, k, (((1,), (1,)), ((), ())),
                                preferred_element_type=jnp.float32)
        s = s * scale + bias
        m = jnp.max(s, axis=-1, keepdims=True)                     # f32 softmax
        p = jnp.exp(s - m)
        p = p * pl.reciprocal(jnp.sum(p, axis=-1, keepdims=True), approx=True)
        o = jnp.dot(p.astype(v.dtype), v, preferred_element_type=jnp.float32)
        o_ref[0, :, h * Dh:(h + 1) * Dh] = o.astype(o_ref.dtype)


def fused_attention(qkv, valid_length, num_heads, tq=256):
    # qkv: (B, S, 3H) bf16; valid_length: (B,) int32
    B, S, H3 = qkv.shape
    H = H3 // 3
    Dh = H // num_heads
    scale = 1.0 / float(Dh) ** 0.5
    tq = _tile(S, tq)
    return pl.pallas_call(
        functools.partial(_attention_kernel, num_heads, scale),
        grid_spec=pltpu.PrefetchScalarGridSpec(
            num_scalar_prefetch=1,
            grid=(B, S // tq),
            in_specs=[
                # query-row slab for this tile
                pl.BlockSpec((1, tq, H3), lambda b, qi, vl: (b, qi, 0)),
                # full K/V slab; block index ignores qi -> stays resident
                pl.BlockSpec((1, S, H3), lambda b, qi, vl: (b, 0, 0)),
            ],
            out_specs=pl.BlockSpec((1, tq, H), lambda b, qi, vl: (b, qi, 0)),
        ),
        out_shape=jax.ShapeDtypeStruct((B, S, H), qkv.dtype),
        compiler_params=pltpu.CompilerParams(
            dimension_semantics=("parallel", "parallel"),
            vmem_limit_bytes=_VMEM_LIMIT),
    )(valid_length.astype(jnp.int32), qkv, qkv)


# ----------------------------------------------------------------------------
# Fused pooler (tanh) + dropout(identity, eval) + classifier head
#   (head weights pre-padded to 128 lanes at init; unmasked stores)
# ----------------------------------------------------------------------------

def _pooler_head_kernel(cls_ref, wp_ref, bp_ref, wc_ref, bc_ref, o_ref):
    pooled = jnp.tanh(
        jnp.dot(cls_ref[...], wp_ref[...],
                preferred_element_type=jnp.float32) + bp_ref[...])
    # dropout: inference-mode identity (nn.Dropout in eval is a no-op)
    # TODO(synk): training-mode stochastic dropout (pltpu.prng) not emitted.
    o_ref[...] = jnp.dot(pooled.astype(wc_ref.dtype), wc_ref[...],
                         preferred_element_type=jnp.float32) + bc_ref[...]


def pooler_and_head(cls_tok, wp, bp, wc_pad, bc_pad, num_classes):
    B, H = cls_tok.shape
    Np = wc_pad.shape[1]
    vmem = pl.BlockSpec(memory_space=pltpu.MemorySpace.VMEM)
    logits = pl.pallas_call(
        _pooler_head_kernel,
        in_specs=[vmem, vmem, vmem, vmem, vmem],
        out_specs=vmem,
        out_shape=jax.ShapeDtypeStruct((B, Np), jnp.float32),
    )(cls_tok, wp, bp.reshape(1, H), wc_pad, bc_pad)
    return logits[:, :num_classes]


# ----------------------------------------------------------------------------
# Deterministic parameter init (synthetic 1-layer BERT + classifier head)
#   GEMM weights + embedding tables stored bf16; biases / LN params f32.
# ----------------------------------------------------------------------------

def init_params(key, vocab, max_seq, hidden, intermediate, num_classes):
    ks = jax.random.split(key, 12)

    def dense(k, i, o):
        return (0.02 * jax.random.normal(k, (i, o), jnp.float32)).astype(jnp.bfloat16)

    def emb(k, n, d):
        return (0.02 * jax.random.normal(k, (n, d), jnp.float32)).astype(jnp.bfloat16)

    # classifier head padded to 128 output lanes once, at init (not per call)
    n_pad = ((num_classes + 127) // 128) * 128
    wc = 0.02 * jax.random.normal(ks[8], (hidden, num_classes), jnp.float32)
    wc_pad = jnp.zeros((hidden, n_pad), jnp.float32).at[:, :num_classes].set(wc)
    bc_pad = jnp.zeros((1, n_pad), jnp.float32)

    return {
        "word_emb": emb(ks[0], vocab, hidden),
        "pos_emb":  emb(ks[1], max_seq, hidden),
        "type_emb": emb(ks[2], 2, hidden),
        "emb_ln_g": jnp.ones((hidden,), jnp.float32),
        "emb_ln_b": jnp.zeros((hidden,), jnp.float32),
        # fused QKV projection (wq|wk|wv concatenated on the output axis)
        "wqkv": dense(ks[3], hidden, 3 * hidden),
        "bqkv": jnp.zeros((3 * hidden,), jnp.float32),
        "wo": dense(ks[4], hidden, hidden), "bo": jnp.zeros((hidden,), jnp.float32),
        "ln1_g": jnp.ones((hidden,), jnp.float32),
        "ln1_b": jnp.zeros((hidden,), jnp.float32),
        "w1": dense(ks[5], hidden, intermediate),
        "b1": jnp.zeros((intermediate,), jnp.float32),
        "w2": dense(ks[6], intermediate, hidden),
        "b2": jnp.zeros((hidden,), jnp.float32),
        "ln2_g": jnp.ones((hidden,), jnp.float32),
        "ln2_b": jnp.zeros((hidden,), jnp.float32),
        "wp": dense(ks[7], hidden, hidden), "bp": jnp.zeros((hidden,), jnp.float32),
        "wc_pad": wc_pad.astype(jnp.bfloat16),
        "bc_pad": bc_pad,
    }


# ----------------------------------------------------------------------------
# BERTClassifier.forward
# ----------------------------------------------------------------------------

def bert_classifier_forward(params, token_ids, valid_length, segment_ids,
                            num_heads, num_classes):
    B, S = token_ids.shape
    H = params["word_emb"].shape[1]

    # 1) gen_attention_mask: folded into the attention kernel (valid_length is
    #    scalar-prefetched and converted to the additive key bias in-kernel).

    # 2) bert embeddings: table gathers are glue; sum + LN fused in one kernel
    word = params["word_emb"][token_ids]                  # (B, S, H) bf16
    typ = params["type_emb"][segment_ids]                 # (B, S, H) bf16
    pos = params["pos_emb"][:S]                           # (S, H) bf16
    xf = embed_layernorm(word, typ, pos,
                         params["emb_ln_g"], params["emb_ln_b"]
                         ).reshape(B * S, H)              # bf16

    # 3) one transformer encoder layer
    #    fused QKV projection, bf16 output consumed directly by attention
    qkv = linear(xf, params["wqkv"], params["bqkv"]).reshape(B, S, 3 * H)
    attn = fused_attention(qkv, valid_length, num_heads)  # (B, S, H) bf16
    #    output projection + residual(x) + layernorm fused in one kernel
    h1 = linear_residual_layernorm(attn.reshape(B * S, H),
                                   params["wo"], params["bo"],
                                   residual=xf,
                                   g=params["ln1_g"], beta=params["ln1_b"])
    #    FFN: gelu matmul (bf16 intermediate), then matmul + residual + LN fused
    ff = linear(h1, params["w1"], params["b1"], act="gelu")
    h2 = linear_residual_layernorm(ff, params["w2"], params["b2"],
                                   residual=h1,
                                   g=params["ln2_g"], beta=params["ln2_b"])
    seq_out = h2.reshape(B, S, H)

    # 4-6) pooler tanh + dropout(identity, eval) + classifier head, fused,
    #      with the 128-lane pre-padded head sliced back to num_classes.
    cls_tok = seq_out[:, 0, :]
    logits = pooler_and_head(cls_tok, params["wp"], params["bp"],
                             params["wc_pad"], params["bc_pad"], num_classes)
    return logits


# ----------------------------------------------------------------------------

if __name__ == "__main__":
    B, S, H, NUM_HEADS, INTER, NUM_CLASSES, VOCAB = 2, 8, 32, 2, 64, 2, 50

    key = jax.random.PRNGKey(0)
    k_tok, k_param = jax.random.split(key, 2)

    token_ids = jax.random.randint(k_tok, (B, S), 0, VOCAB, dtype=jnp.int32)
    segment_ids = jnp.zeros((B, S), dtype=jnp.int32)
    valid_length = jnp.array([5, 8], dtype=jnp.int32)

    params = init_params(k_param, VOCAB, S, H, INTER, NUM_CLASSES)

    fwd = jax.jit(bert_classifier_forward,
                  static_argnames=("num_heads", "num_classes"))
    logits = fwd(params, token_ids, valid_length, segment_ids,
                 num_heads=NUM_HEADS, num_classes=NUM_CLASSES)
    jax.block_until_ready(logits)
    assert logits.shape == (B, NUM_CLASSES)
    assert logits.dtype == jnp.float32
    print("KERNEL_OK")
</pallas_src>

<mosaic_0001>
module attributes {stable_mosaic.version = 11 : i64} {
  func.func @_embed_ln_kernel(%arg0: i32, %arg1: i32, %arg2: memref<1x8x32xbf16, #tpu.memory_space<vmem>>, %arg3: memref<1x8x32xbf16, #tpu.memory_space<vmem>>, %arg4: memref<8x32xbf16, #tpu.memory_space<vmem>>, %arg5: memref<1x32xf32, #tpu.memory_space<vmem>>, %arg6: memref<1x32xf32, #tpu.memory_space<vmem>>, %arg7: memref<1x8x32xbf16, #tpu.memory_space<vmem>>) attributes {dimension_semantics = [#tpu.dimension_semantics<parallel>, #tpu.dimension_semantics<parallel>], iteration_bounds = array<i64: 2, 1>, scalar_prefetch = 0 : i64, scratch_operands = 0 : i64, tpu.core_type = #tpu.core_type<tc>, window_params = [{transform_indices = @transform_0, window_bounds = array<i64: 1, 8, 32>}, {transform_indices = @transform_1, window_bounds = array<i64: 1, 8, 32>}, {transform_indices = @transform_2, window_bounds = array<i64: 8, 32>}, {pipeline_mode = #tpu.pipeline_mode<synchronous>, transform_indices = @transform_3, window_bounds = array<i64: 1, 32>}, {pipeline_mode = #tpu.pipeline_mode<synchronous>, transform_indices = @transform_4, window_bounds = array<i64: 1, 32>}, {transform_indices = @transform_5, window_bounds = array<i64: 1, 8, 32>}]} {
    %c0 = arith.constant 0 : index
    %c0_0 = arith.constant 0 : index
    %c0_1 = arith.constant 0 : index
    %0 = vector.load %arg2[%c0, %c0_0, %c0_1] : memref<1x8x32xbf16, #tpu.memory_space<vmem>>, vector<1x8x32xbf16>
    %1 = vector.shape_cast %0 : vector<1x8x32xbf16> to vector<8x32xbf16>
    %2 = arith.extf %1 : vector<8x32xbf16> to vector<8x32xf32>
    %c0_2 = arith.constant 0 : index
    %c0_3 = arith.constant 0 : index
    %c0_4 = arith.constant 0 : index
    %3 = vector.load %arg3[%c0_2, %c0_3, %c0_4] : memref<1x8x32xbf16, #tpu.memory_space<vmem>>, vector<1x8x32xbf16>
    %4 = vector.shape_cast %3 : vector<1x8x32xbf16> to vector<8x32xbf16>
    %5 = arith.extf %4 : vector<8x32xbf16> to vector<8x32xf32>
    %6 = arith.addf %2, %5 : vector<8x32xf32>
    %c0_5 = arith.constant 0 : index
    %c0_6 = arith.constant 0 : index
    %7 = vector.load %arg4[%c0_5, %c0_6] : memref<8x32xbf16, #tpu.memory_space<vmem>>, vector<8x32xbf16>
    %8 = arith.extf %7 : vector<8x32xbf16> to vector<8x32xf32>
    %9 = arith.addf %6, %8 : vector<8x32xf32>
    %cst = arith.constant dense<0.000000e+00> : vector<8xf32>
    %10 = vector.multi_reduction <add>, %9, %cst [1] : vector<8x32xf32> to vector<8xf32>
    %11 = vector.shape_cast %10 : vector<8xf32> to vector<8x1xf32>
    %cst_7 = arith.constant 3.200000e+01 : f32
    %12 = vector.broadcast %cst_7 : f32 to vector<8x1xf32>
    %13 = arith.divf %11, %12 : vector<8x1xf32>
    %14 = vector.broadcast %13 : vector<8x1xf32> to vector<8x32xf32>
    %15 = arith.subf %9, %14 : vector<8x32xf32>
    %16 = arith.mulf %15, %15 : vector<8x32xf32>
    %cst_8 = arith.constant dense<0.000000e+00> : vector<8xf32>
    %17 = vector.multi_reduction <add>, %16, %cst_8 [1] : vector<8x32xf32> to vector<8xf32>
    %18 = vector.shape_cast %17 : vector<8xf32> to vector<8x1xf32>
    %cst_9 = arith.constant 3.200000e+01 : f32
    %19 = vector.broadcast %cst_9 : f32 to vector<8x1xf32>
    %20 = arith.divf %18, %19 : vector<8x1xf32>
    %21 = vector.broadcast %13 : vector<8x1xf32> to vector<8x32xf32>
    %22 = arith.subf %9, %21 : vector<8x32xf32>
    %cst_10 = arith.constant 9.99999996E-13 : f32
    %23 = vector.broadcast %cst_10 : f32 to vector<8x1xf32>
    %24 = arith.addf %20, %23 : vector<8x1xf32>
    %25 = math.rsqrt %24 : vector<8x1xf32>
    %26 = vector.broadcast %25 : vector<8x1xf32> to vector<8x32xf32>
    %27 = arith.mulf %22, %26 : vector<8x32xf32>
    %c0_11 = arith.constant 0 : index
    %c0_12 = arith.constant 0 : index
    %28 = vector.load %arg5[%c0_11, %c0_12] : memref<1x32xf32, #tpu.memory_space<vmem>>, vector<1x32xf32>
    %29 = vector.broadcast %28 : vector<1x32xf32> to vector<8x32xf32>
    %30 = arith.mulf %27, %29 : vector<8x32xf32>
    %c0_13 = arith.constant 0 : index
    %c0_14 = arith.constant 0 : index
    %31 = vector.load %arg6[%c0_13, %c0_14] : memref<1x32xf32, #tpu.memory_space<vmem>>, vector<1x32xf32>
    %32 = vector.broadcast %31 : vector<1x32xf32> to vector<8x32xf32>
    %33 = arith.addf %30, %32 : vector<8x32xf32>
    %34 = arith.truncf %33 : vector<8x32xf32> to vector<8x32xbf16>
    %c0_15 = arith.constant 0 : index
    %c0_16 = arith.constant 0 : index
    %c0_17 = arith.constant 0 : index
    %35 = vector.load %arg7[%c0_15, %c0_16, %c0_17] : memref<1x8x32xbf16, #tpu.memory_space<vmem>>, vector<1x8x32xbf16>
    %36 = vector.shape_cast %35 : vector<1x8x32xbf16> to vector<8x32xbf16>
    %37 = vector.shape_cast %34 : vector<8x32xbf16> to vector<1x8x32xbf16>
    tpu.vector_store %arg7[%c0_15, %c0_16, %c0_17], %37 {strides = array<i32>} : memref<1x8x32xbf16, #tpu.memory_space<vmem>>, vector<1x8x32xbf16>,
    return
  }
  func.func @transform_0(%arg0: i32, %arg1: i32) -> (i32, i32, i32) {
    %c0_i32 = arith.constant 0 : i32
    %c0_i32_0 = arith.constant 0 : i32
    return %arg0, %arg1, %c0_i32 : i32, i32, i32
  }
  func.func @transform_1(%arg0: i32, %arg1: i32) -> (i32, i32, i32) {
    %c0_i32 = arith.constant 0 : i32
    %c0_i32_0 = arith.constant 0 : i32
    return %arg0, %arg1, %c0_i32 : i32, i32, i32
  }
  func.func @transform_2(%arg0: i32, %arg1: i32) -> (i32, i32) {
    %c0_i32 = arith.constant 0 : i32
    %c0_i32_0 = arith.constant 0 : i32
    return %arg1, %c0_i32 : i32, i32
  }
  func.func @transform_3(%arg0: i32, %arg1: i32) -> (i32, i32) {
    %c0_i32 = arith.constant 0 : i32
    %c0_i32_0 = arith.constant 0 : i32
    %c0_i32_1 = arith.constant 0 : i32
    return %c0_i32, %c0_i32_0 : i32, i32
  }
  func.func @transform_4(%arg0: i32, %arg1: i32) -> (i32, i32) {
    %c0_i32 = arith.constant 0 : i32
    %c0_i32_0 = arith.constant 0 : i32
    %c0_i32_1 = arith.constant 0 : i32
    return %c0_i32, %c0_i32_0 : i32, i32
  }
  func.func @transform_5(%arg0: i32, %arg1: i32) -> (i32, i32, i32) {
    %c0_i32 = arith.constant 0 : i32
    %c0_i32_0 = arith.constant 0 : i32
    return %arg0, %arg1, %c0_i32 : i32, i32, i32
  }
}

module attributes {stable_mosaic.version = 11 : i64} {
  func.func @_matmul_kernel(%arg0: i32, %arg1: i32, %arg2: i32, %arg3: memref<16x32xbf16, #tpu.memory_space<vmem>>, %arg4: memref<32x96xbf16, #tpu.memory_space<vmem>>, %arg5: memref<1x96xf32, #tpu.memory_space<vmem>>, %arg6: memref<16x96xbf16, #tpu.memory_space<vmem>>, %arg7: memref<16x96xf32, #tpu.memory_space<vmem>>) attributes {dimension_semantics = [#tpu.dimension_semantics<parallel>, #tpu.dimension_semantics<parallel>, #tpu.dimension_semantics<arbitrary>], iteration_bounds = array<i64: 1, 1, 1>, scalar_prefetch = 0 : i64, scratch_operands = 1 : i64, tpu.core_type = #tpu.core_type<tc>, window_params = [{transform_indices = @transform_0, window_bounds = array<i64: 16, 32>}, {transform_indices = @transform_1, window_bounds = array<i64: 32, 96>}, {transform_indices = @transform_2, window_bounds = array<i64: 1, 96>}, {transform_indices = @transform_3, window_bounds = array<i64: 16, 96>}]} {
    %c0_i32 = arith.constant 0 : i32
    %0 = arith.cmpi eq, %arg2, %c0_i32 : i32
    %1 = arith.extui %0 : i1 to i32
    %c0_i32_0 = arith.constant 0 : i32
    %2 = arith.cmpi ne, %1, %c0_i32_0 : i32
    scf.if %2 {
      %cst_10 = arith.constant 0.000000e+00 : f32
      %12 = vector.broadcast %cst_10 : f32 to vector<16x96xf32>
      %c0_11 = arith.constant 0 : index
      %c0_12 = arith.constant 0 : index
      %13 = vector.load %arg7[%c0_11, %c0_12] : memref<16x96xf32, #tpu.memory_space<vmem>>, vector<16x96xf32>
      tpu.vector_store %arg7[%c0_11, %c0_12], %12 {strides = array<i32>} : memref<16x96xf32, #tpu.memory_space<vmem>>, vector<16x96xf32>,
    } else {
    }
    %c0 = arith.constant 0 : index
    %c0_1 = arith.constant 0 : index
    %3 = vector.load %arg7[%c0, %c0_1] : memref<16x96xf32, #tpu.memory_space<vmem>>, vector<16x96xf32>
    %c0_2 = arith.constant 0 : index
    %c0_3 = arith.constant 0 : index
    %4 = vector.load %arg3[%c0_2, %c0_3] : memref<16x32xbf16, #tpu.memory_space<vmem>>, vector<16x32xbf16>
    %c0_4 = arith.constant 0 : index
    %c0_5 = arith.constant 0 : index
    %5 = vector.load %arg4[%c0_4, %c0_5] : memref<32x96xbf16, #tpu.memory_space<vmem>>, vector<32x96xbf16>
    %cst = arith.constant dense<0.000000e+00> : vector<16x96xf32>
    %6 = tpu.matmul %4, %5, %cst {dimension_numbers = #tpu.dot_dimension_numbers<[1], [0], [0], [1], [0, 0, 1, 1], [], []>} : vector<16x32xbf16>, vector<32x96xbf16>, vector<16x96xf32> -> vector<16x96xf32>
    %7 = arith.addf %3, %6 : vector<16x96xf32>
    %c0_6 = arith.constant 0 : index
    %c0_7 = arith.constant 0 : index
    %8 = vector.load %arg7[%c0_6, %c0_7] : memref<16x96xf32, #tpu.memory_space<vmem>>, vector<16x96xf32>
    tpu.vector_store %arg7[%c0_6, %c0_7], %7 {strides = array<i32>} : memref<16x96xf32, #tpu.memory_space<vmem>>, vector<16x96xf32>,
    %c0_i32_8 = arith.constant 0 : i32
    %9 = arith.cmpi eq, %arg2, %c0_i32_8 : i32
    %10 = arith.extui %9 : i1 to i32
    %c0_i32_9 = arith.constant 0 : i32
    %11 = arith.cmpi ne, %10, %c0_i32_9 : i32
    scf.if %11 {
      %c0_10 = arith.constant 0 : index
      %c0_11 = arith.constant 0 : index
      %12 = vector.load %arg7[%c0_10, %c0_11] : memref<16x96xf32, #tpu.memory_space<vmem>>, vector<16x96xf32>
      %c0_12 = arith.constant 0 : index
      %c0_13 = arith.constant 0 : index
      %13 = vector.load %arg5[%c0_12, %c0_13] : memref<1x96xf32, #tpu.memory_space<vmem>>, vector<1x96xf32>
      %14 = vector.broadcast %13 : vector<1x96xf32> to vector<16x96xf32>
      %15 = arith.addf %12, %14 : vector<16x96xf32>
      %16 = arith.truncf %15 : vector<16x96xf32> to vector<16x96xbf16>
      %c0_14 = arith.constant 0 : index
      %c0_15 = arith.constant 0 : index
      %17 = vector.load %arg6[%c0_14, %c0_15] : memref<16x96xbf16, #tpu.memory_space<vmem>>, vector<16x96xbf16>
      tpu.vector_store %arg6[%c0_14, %c0_15], %16 {strides = array<i32>} : memref<16x96xbf16, #tpu.memory_space<vmem>>, vector<16x96xbf16>,
    } else {
    }
    return
  }
  func.func @transform_0(%arg0: i32, %arg1: i32, %arg2: i32) -> (i32, i32) {
    %c0_i32 = arith.constant 0 : i32
    return %arg0, %arg2 : i32, i32
  }
  func.func @transform_1(%arg0: i32, %arg1: i32, %arg2: i32) -> (i32, i32) {
    %c0_i32 = arith.constant 0 : i32
    return %arg2, %arg1 : i32, i32
  }
  func.func @transform_2(%arg0: i32, %arg1: i32, %arg2: i32) -> (i32, i32) {
    %c0_i32 = arith.constant 0 : i32
    %c0_i32_0 = arith.constant 0 : i32
    return %c0_i32, %arg1 : i32, i32
  }
  func.func @transform_3(%arg0: i32, %arg1: i32, %arg2: i32) -> (i32, i32) {
    %c0_i32 = arith.constant 0 : i32
    return %arg0, %arg1 : i32, i32
  }
}

module attributes {stable_mosaic.version = 11 : i64} {
  func.func @_matmul_res_ln_kernel(%arg0: i32, %arg1: i32, %arg2: memref<16x32xbf16, #tpu.memory_space<vmem>>, %arg3: memref<32x32xbf16, #tpu.memory_space<vmem>>, %arg4: memref<1x32xf32, #tpu.memory_space<vmem>>, %arg5: memref<16x32xbf16, #tpu.memory_space<vmem>>, %arg6: memref<1x32xf32, #tpu.memory_space<vmem>>, %arg7: memref<1x32xf32, #tpu.memory_space<vmem>>, %arg8: memref<16x32xbf16, #tpu.memory_space<vmem>>, %arg9: memref<16x32xf32, #tpu.memory_space<vmem>>) attributes {dimension_semantics = [#tpu.dimension_semantics<parallel>, #tpu.dimension_semantics<arbitrary>], iteration_bounds = array<i64: 1, 1>, scalar_prefetch = 0 : i64, scratch_operands = 1 : i64, tpu.core_type = #tpu.core_type<tc>, window_params = [{transform_indices = @transform_0, window_bounds = array<i64: 16, 32>}, {transform_indices = @transform_1, window_bounds = array<i64: 32, 32>}, {pipeline_mode = #tpu.pipeline_mode<synchronous>, transform_indices = @transform_2, window_bounds = array<i64: 1, 32>}, {transform_indices = @transform_3, window_bounds = array<i64: 16, 32>}, {pipeline_mode = #tpu.pipeline_mode<synchronous>, transform_indices = @transform_4, window_bounds = array<i64: 1, 32>}, {pipeline_mode = #tpu.pipeline_mode<synchronous>, transform_indices = @transform_5, window_bounds = array<i64: 1, 32>}, {transform_indices = @transform_6, window_bounds = array<i64: 16, 32>}]} {
    %c0_i32 = arith.constant 0 : i32
    %0 = arith.cmpi eq, %arg1, %c0_i32 : i32
    %1 = arith.extui %0 : i1 to i32
    %c0_i32_0 = arith.constant 0 : i32
    %2 = arith.cmpi ne, %1, %c0_i32_0 : i32
    scf.if %2 {
      %cst_10 = arith.constant 0.000000e+00 : f32
      %12 = vector.broadcast %cst_10 : f32 to vector<16x32xf32>
      %c0_11 = arith.constant 0 : index
      %c0_12 = arith.constant 0 : index
      %13 = vector.load %arg9[%c0_11, %c0_12] : memref<16x32xf32, #tpu.memory_space<vmem>>, vector<16x32xf32>
      tpu.vector_store %arg9[%c0_11, %c0_12], %12 {strides = array<i32>} : memref<16x32xf32, #tpu.memory_space<vmem>>, vector<16x32xf32>,
    } else {
    }
    %c0 = arith.constant 0 : index
    %c0_1 = arith.constant 0 : index
    %3 = vector.load %arg9[%c0, %c0_1] : memref<16x32xf32, #tpu.memory_space<vmem>>, vector<16x32xf32>
    %c0_2 = arith.constant 0 : index
    %c0_3 = arith.constant 0 : index
    %4 = vector.load %arg2[%c0_2, %c0_3] : memref<16x32xbf16, #tpu.memory_space<vmem>>, vector<16x32xbf16>
    %c0_4 = arith.constant 0 : index
    %c0_5 = arith.constant 0 : index
    %5 = vector.load %arg3[%c0_4, %c0_5] : memref<32x32xbf16, #tpu.memory_space<vmem>>, vector<32x32xbf16>
    %cst = arith.constant dense<0.000000e+00> : vector<16x32xf32>
    %6 = tpu.matmul %4, %5, %cst {dimension_numbers = #tpu.dot_dimension_numbers<[1], [0], [0], [1], [0, 0, 1, 1], [], []>} : vector<16x32xbf16>, vector<32x32xbf16>, vector<16x32xf32> -> vector<16x32xf32>
    %7 = arith.addf %3, %6 : vector<16x32xf32>
    %c0_6 = arith.constant 0 : index
    %c0_7 = arith.constant 0 : index
    %8 = vector.load %arg9[%c0_6, %c0_7] : memref<16x32xf32, #tpu.memory_space<vmem>>, vector<16x32xf32>
    tpu.vector_store %arg9[%c0_6, %c0_7], %7 {strides = array<i32>} : memref<16x32xf32, #tpu.memory_space<vmem>>, vector<16x32xf32>,
    %c0_i32_8 = arith.constant 0 : i32
    %9 = arith.cmpi eq, %arg1, %c0_i32_8 : i32
    %10 = arith.extui %9 : i1 to i32
    %c0_i32_9 = arith.constant 0 : i32
    %11 = arith.cmpi ne, %10, %c0_i32_9 : i32
    scf.if %11 {
      %c0_10 = arith.constant 0 : index
      %c0_11 = arith.constant 0 : index
      %12 = vector.load %arg9[%c0_10, %c0_11] : memref<16x32xf32, #tpu.memory_space<vmem>>, vector<16x32xf32>
      %c0_12 = arith.constant 0 : index
      %c0_13 = arith.constant 0 : index
      %13 = vector.load %arg4[%c0_12, %c0_13] : memref<1x32xf32, #tpu.memory_space<vmem>>, vector<1x32xf32>
      %14 = vector.broadcast %13 : vector<1x32xf32> to vector<16x32xf32>
      %15 = arith.addf %12, %14 : vector<16x32xf32>
      %c0_14 = arith.constant 0 : index
      %c0_15 = arith.constant 0 : index
      %16 = vector.load %arg5[%c0_14, %c0_15] : memref<16x32xbf16, #tpu.memory_space<vmem>>, vector<16x32xbf16>
      %17 = arith.extf %16 : vector<16x32xbf16> to vector<16x32xf32>
      %18 = arith.addf %15, %17 : vector<16x32xf32>
      %cst_16 = arith.constant dense<0.000000e+00> : vector<16xf32>
      %19 = vector.multi_reduction <add>, %18, %cst_16 [1] : vector<16x32xf32> to vector<16xf32>
      %20 = vector.shape_cast %19 : vector<16xf32> to vector<16x1xf32>
      %cst_17 = arith.constant 3.200000e+01 : f32
      %21 = vector.broadcast %cst_17 : f32 to vector<16x1xf32>
      %22 = arith.divf %20, %21 : vector<16x1xf32>
      %23 = vector.broadcast %22 : vector<16x1xf32> to vector<16x32xf32>
      %24 = arith.subf %18, %23 : vector<16x32xf32>
      %25 = arith.mulf %24, %24 : vector<16x32xf32>
      %cst_18 = arith.constant dense<0.000000e+00> : vector<16xf32>
      %26 = vector.multi_reduction <add>, %25, %cst_18 [1] : vector<16x32xf32> to vector<16xf32>
      %27 = vector.shape_cast %26 : vector<16xf32> to vector<16x1xf32>
      %cst_19 = arith.constant 3.200000e+01 : f32
      %28 = vector.broadcast %cst_19 : f32 to vector<16x1xf32>
      %29 = arith.divf %27, %28 : vector<16x1xf32>
      %30 = vector.broadcast %22 : vector<16x1xf32> to vector<16x32xf32>
      %31 = arith.subf %18, %30 : vector<16x32xf32>
      %cst_20 = arith.constant 9.99999996E-13 : f32
      %32 = vector.broadcast %cst_20 : f32 to vector<16x1xf32>
      %33 = arith.addf %29, %32 : vector<16x1xf32>
      %34 = math.rsqrt %33 : vector<16x1xf32>
      %35 = vector.broadcast %34 : vector<16x1xf32> to vector<16x32xf32>
      %36 = arith.mulf %31, %35 : vector<16x32xf32>
      %c0_21 = arith.constant 0 : index
      %c0_22 = arith.constant 0 : index
      %37 = vector.load %arg6[%c0_21, %c0_22] : memref<1x32xf32, #tpu.memory_space<vmem>>, vector<1x32xf32>
      %38 = vector.broadcast %37 : vector<1x32xf32> to vector<16x32xf32>
      %39 = arith.mulf %36, %38 : vector<16x32xf32>
      %c0_23 = arith.constant 0 : index
      %c0_24 = arith.constant 0 : index
      %40 = vector.load %arg7[%c0_23, %c0_24] : memref<1x32xf32, #tpu.memory_space<vmem>>, vector<1x32xf32>
      %41 = vector.broadcast %40 : vector<1x32xf32> to vector<16x32xf32>
      %42 = arith.addf %39, %41 : vector<16x32xf32>
      %43 = arith.truncf %42 : vector<16x32xf32> to vector<16x32xbf16>
      %c0_25 = arith.constant 0 : index
      %c0_26 = arith.constant 0 : index
      %44 = vector.load %arg8[%c0_25, %c0_26] : memref<16x32xbf16, #tpu.memory_space<vmem>>, vector<16x32xbf16>
      tpu.vector_store %arg8[%c0_25, %c0_26], %43 {strides = array<i32>} : memref<16x32xbf16, #tpu.memory_space<vmem>>, vector<16x32xbf16>,
    } else {
    }
    return
  }
  func.func @transform_0(%arg0: i32, %arg1: i32) -> (i32, i32) {
    %c0_i32 = arith.constant 0 : i32
    return %arg0, %arg1 : i32, i32
  }
  func.func @transform_1(%arg0: i32, %arg1: i32) -> (i32, i32) {
    %c0_i32 = arith.constant 0 : i32
    %c0_i32_0 = arith.constant 0 : i32
    return %arg1, %c0_i32 : i32, i32
  }
  func.func @transform_2(%arg0: i32, %arg1: i32) -> (i32, i32) {
    %c0_i32 = arith.constant 0 : i32
    %c0_i32_0 = arith.constant 0 : i32
    %c0_i32_1 = arith.constant 0 : i32
    return %c0_i32, %c0_i32_0 : i32, i32
  }
  func.func @transform_3(%arg0: i32, %arg1: i32) -> (i32, i32) {
    %c0_i32 = arith.constant 0 : i32
    %c0_i32_0 = arith.constant 0 : i32
    return %arg0, %c0_i32 : i32, i32
  }
  func.func @transform_4(%arg0: i32, %arg1: i32) -> (i32, i32) {
    %c0_i32 = arith.constant 0 : i32
    %c0_i32_0 = arith.constant 0 : i32
    %c0_i32_1 = arith.constant 0 : i32
    return %c0_i32, %c0_i32_0 : i32, i32
  }
  func.func @transform_5(%arg0: i32, %arg1: i32) -> (i32, i32) {
    %c0_i32 = arith.constant 0 : i32
    %c0_i32_0 = arith.constant 0 : i32
    %c0_i32_1 = arith.constant 0 : i32
    return %c0_i32, %c0_i32_0 : i32, i32
  }
  func.func @transform_6(%arg0: i32, %arg1: i32) -> (i32, i32) {
    %c0_i32 = arith.constant 0 : i32
    %c0_i32_0 = arith.constant 0 : i32
    return %arg0, %c0_i32 : i32, i32
  }
}

module attributes {stable_mosaic.version = 11 : i64} {
  func.func @_attention_kernel(%arg0: i32, %arg1: i32, %arg2: memref<2xi32, #tpu.memory_space<smem>>, %arg3: memref<1x8x96xbf16, #tpu.memory_space<vmem>>, %arg4: memref<1x8x96xbf16, #tpu.memory_space<vmem>>, %arg5: memref<1x8x32xbf16, #tpu.memory_space<vmem>>) attributes {dimension_semantics = [#tpu.dimension_semantics<parallel>, #tpu.dimension_semantics<parallel>], iteration_bounds = array<i64: 2, 1>, scalar_prefetch = 1 : i64, scratch_operands = 0 : i64, tpu.core_type = #tpu.core_type<tc>, window_params = [{transform_indices = @transform_0, window_bounds = array<i64: 1, 8, 96>}, {transform_indices = @transform_1, window_bounds = array<i64: 1, 8, 96>}, {transform_indices = @transform_2, window_bounds = array<i64: 1, 8, 32>}]} {
    %0 = arith.index_cast %arg0 : i32 to index
    %1 = memref.load %arg2[%0] : memref<2xi32, #tpu.memory_space<smem>>
    %2 = tpu.iota {dimensions = array<i32: 1>} : vector<1x8xi32>
    %3 = vector.broadcast %1 : i32 to vector<1x8xi32>
    %4 = arith.cmpi slt, %2, %3 : vector<1x8xi32>
    %cst = arith.constant 0.000000e+00 : f32
    %cst_0 = arith.constant -1.000000e+09 : f32
    %5 = vector.broadcast %cst : f32 to vector<1x8xf32>
    %6 = vector.broadcast %cst_0 : f32 to vector<1x8xf32>
    %7 = arith.select %4, %5, %6 : vector<1x8xi1>, vector<1x8xf32>
    %c0 = arith.constant 0 : index
    %c0_1 = arith.constant 0 : index
    %c0_2 = arith.constant 0 : index
    %8 = vector.load %arg3[%c0, %c0_1, %c0_2] : memref<1x8x96xbf16, #tpu.memory_space<vmem>>, vector<1x8x16xbf16>
    %9 = vector.shape_cast %8 : vector<1x8x16xbf16> to vector<8x16xbf16>
    %c0_3 = arith.constant 0 : index
    %c0_4 = arith.constant 0 : index
    %c32 = arith.constant 32 : index
    %10 = vector.load %arg4[%c0_3, %c0_4, %c32] : memref<1x8x96xbf16, #tpu.memory_space<vmem>>, vector<1x8x16xbf16>
    %11 = vector.shape_cast %10 : vector<1x8x16xbf16> to vector<8x16xbf16>
    %c0_5 = arith.constant 0 : index
    %c0_6 = arith.constant 0 : index
    %c64 = arith.constant 64 : index
    %12 = vector.load %arg4[%c0_5, %c0_6, %c64] : memref<1x8x96xbf16, #tpu.memory_space<vmem>>, vector<1x8x16xbf16>
    %13 = vector.shape_cast %12 : vector<1x8x16xbf16> to vector<8x16xbf16>
    %cst_7 = arith.constant dense<0.000000e+00> : vector<8x8xf32>
    %14 = tpu.matmul %9, %11, %cst_7 {dimension_numbers = #tpu.dot_dimension_numbers<[1], [1], [0], [0], [0, 0, 1, 0], [], []>} : vector<8x16xbf16>, vector<8x16xbf16>, vector<8x8xf32> -> vector<8x8xf32>
    %cst_8 = arith.constant 2.500000e-01 : f32
    %15 = vector.broadcast %cst_8 : f32 to vector<8x8xf32>
    %16 = arith.mulf %14, %15 : vector<8x8xf32>
    %17 = vector.broadcast %7 : vector<1x8xf32> to vector<8x8xf32>
    %18 = arith.addf %16, %17 : vector<8x8xf32>
    %cst_9 = arith.constant dense<0xFF800000> : vector<8xf32>
    %19 = vector.multi_reduction <maximumf>, %18, %cst_9 [1] : vector<8x8xf32> to vector<8xf32>
    %20 = vector.shape_cast %19 : vector<8xf32> to vector<8x1xf32>
    %21 = vector.broadcast %20 : vector<8x1xf32> to vector<8x8xf32>
    %22 = arith.subf %18, %21 : vector<8x8xf32>
    %23 = math.exp %22 : vector<8x8xf32>
    %cst_10 = arith.constant dense<0.000000e+00> : vector<8xf32>
    %24 = vector.multi_reduction <add>, %23, %cst_10 [1] : vector<8x8xf32> to vector<8xf32>
    %25 = vector.shape_cast %24 : vector<8xf32> to vector<8x1xf32>
    %26 = tpu.reciprocal %25 {approx = true} : vector<8x1xf32> -> vector<8x1xf32>
    %27 = vector.broadcast %26 : vector<8x1xf32> to vector<8x8xf32>
    %28 = arith.mulf %23, %27 : vector<8x8xf32>
    %29 = arith.truncf %28 : vector<8x8xf32> to vector<8x8xbf16>
    %cst_11 = arith.constant dense<0.000000e+00> : vector<8x16xf32>
    %30 = tpu.matmul %29, %13, %cst_11 {dimension_numbers = #tpu.dot_dimension_numbers<[1], [0], [0], [1], [0, 0, 1, 1], [], []>} : vector<8x8xbf16>, vector<8x16xbf16>, vector<8x16xf32> -> vector<8x16xf32>
    %31 = arith.truncf %30 : vector<8x16xf32> to vector<8x16xbf16>
    %c0_12 = arith.constant 0 : index
    %c0_13 = arith.constant 0 : index
    %c0_14 = arith.constant 0 : index
    %32 = vector.load %arg5[%c0_12, %c0_13, %c0_14] : memref<1x8x32xbf16, #tpu.memory_space<vmem>>, vector<1x8x16xbf16>
    %33 = vector.shape_cast %32 : vector<1x8x16xbf16> to vector<8x16xbf16>
    %34 = vector.shape_cast %31 : vector<8x16xbf16> to vector<1x8x16xbf16>
    tpu.vector_store %arg5[%c0_12, %c0_13, %c0_14], %34 {strides = array<i32>} : memref<1x8x32xbf16, #tpu.memory_space<vmem>>, vector<1x8x16xbf16>,
    %c0_15 = arith.constant 0 : index
    %c0_16 = arith.constant 0 : index
    %c16 = arith.constant 16 : index
    %35 = vector.load %arg3[%c0_15, %c0_16, %c16] : memref<1x8x96xbf16, #tpu.memory_space<vmem>>, vector<1x8x16xbf16>
    %36 = vector.shape_cast %35 : vector<1x8x16xbf16> to vector<8x16xbf16>
    %c0_17 = arith.constant 0 : index
    %c0_18 = arith.constant 0 : index
    %c48 = arith.constant 48 : index
    %37 = vector.load %arg4[%c0_17, %c0_18, %c48] : memref<1x8x96xbf16, #tpu.memory_space<vmem>>, vector<1x8x16xbf16>
    %38 = vector.shape_cast %37 : vector<1x8x16xbf16> to vector<8x16xbf16>
    %c0_19 = arith.constant 0 : index
    %c0_20 = arith.constant 0 : index
    %c80 = arith.constant 80 : index
    %39 = vector.load %arg4[%c0_19, %c0_20, %c80] : memref<1x8x96xbf16, #tpu.memory_space<vmem>>, vector<1x8x16xbf16>
    %40 = vector.shape_cast %39 : vector<1x8x16xbf16> to vector<8x16xbf16>
    %cst_21 = arith.constant dense<0.000000e+00> : vector<8x8xf32>
    %41 = tpu.matmul %36, %38, %cst_21 {dimension_numbers = #tpu.dot_dimension_numbers<[1], [1], [0], [0], [0, 0, 1, 0], [], []>} : vector<8x16xbf16>, vector<8x16xbf16>, vector<8x8xf32> -> vector<8x8xf32>
    %cst_22 = arith.constant 2.500000e-01 : f32
    %42 = vector.broadcast %cst_22 : f32 to vector<8x8xf32>
    %43 = arith.mulf %41, %42 : vector<8x8xf32>
    %44 = vector.broadcast %7 : vector<1x8xf32> to vector<8x8xf32>
    %45 = arith.addf %43, %44 : vector<8x8xf32>
    %cst_23 = arith.constant dense<0xFF800000> : vector<8xf32>
    %46 = vector.multi_reduction <maximumf>, %45, %cst_23 [1] : vector<8x8xf32> to vector<8xf32>
    %47 = vector.shape_cast %46 : vector<8xf32> to vector<8x1xf32>
    %48 = vector.broadcast %47 : vector<8x1xf32> to vector<8x8xf32>
    %49 = arith.subf %45, %48 : vector<8x8xf32>
    %50 = math.exp %49 : vector<8x8xf32>
    %cst_24 = arith.constant dense<0.000000e+00> : vector<8xf32>
    %51 = vector.multi_reduction <add>, %50, %cst_24 [1] : vector<8x8xf32> to vector<8xf32>
    %52 = vector.shape_cast %51 : vector<8xf32> to vector<8x1xf32>
    %53 = tpu.reciprocal %52 {approx = true} : vector<8x1xf32> -> vector<8x1xf32>
    %54 = vector.broadcast %53 : vector<8x1xf32> to vector<8x8xf32>
    %55 = arith.mulf %50, %54 : vector<8x8xf32>
    %56 = arith.truncf %55 : vector<8x8xf32> to vector<8x8xbf16>
    %cst_25 = arith.constant dense<0.000000e+00> : vector<8x16xf32>
    %57 = tpu.matmul %56, %40, %cst_25 {dimension_numbers = #tpu.dot_dimension_numbers<[1], [0], [0], [1], [0, 0, 1, 1], [], []>} : vector<8x8xbf16>, vector<8x16xbf16>, vector<8x16xf32> -> vector<8x16xf32>
    %58 = arith.truncf %57 : vector<8x16xf32> to vector<8x16xbf16>
    %c0_26 = arith.constant 0 : index
    %c0_27 = arith.constant 0 : index
    %c16_28 = arith.constant 16 : index
    %59 = vector.load %arg5[%c0_26, %c0_27, %c16_28] : memref<1x8x32xbf16, #tpu.memory_space<vmem>>, vector<1x8x16xbf16>
    %60 = vector.shape_cast %59 : vector<1x8x16xbf16> to vector<8x16xbf16>
    %61 = vector.shape_cast %58 : vector<8x16xbf16> to vector<1x8x16xbf16>
    tpu.vector_store %arg5[%c0_26, %c0_27, %c16_28], %61 {strides = array<i32>} : memref<1x8x32xbf16, #tpu.memory_space<vmem>>, vector<1x8x16xbf16>,
    return
  }
  func.func @transform_0(%arg0: i32, %arg1: i32, %arg2: memref<2xi32, #tpu.memory_space<smem>>) -> (i32, i32, i32) {
    %c0_i32 = arith.constant 0 : i32
    %c0_i32_0 = arith.constant 0 : i32
    return %arg0, %arg1, %c0_i32 : i32, i32, i32
  }
  func.func @transform_1(%arg0: i32, %arg1: i32, %arg2: memref<2xi32, #tpu.memory_space<smem>>) -> (i32, i32, i32) {
    %c0_i32 = arith.constant 0 : i32
    %c0_i32_0 = arith.constant 0 : i32
    %c0_i32_1 = arith.constant 0 : i32
    return %arg0, %c0_i32, %c0_i32_0 : i32, i32, i32
  }
  func.func @transform_2(%arg0: i32, %arg1: i32, %arg2: memref<2xi32, #tpu.memory_space<smem>>) -> (i32, i32, i32) {
    %c0_i32 = arith.constant 0 : i32
    %c0_i32_0 = arith.constant 0 : i32
    return %arg0, %arg1, %c0_i32 : i32, i32, i32
  }
}

module attributes {stable_mosaic.version = 11 : i64} {
  func.func @_matmul_kernel(%arg0: i32, %arg1: i32, %arg2: i32, %arg3: memref<16x32xbf16, #tpu.memory_space<vmem>>, %arg4: memref<32x64xbf16, #tpu.memory_space<vmem>>, %arg5: memref<1x64xf32, #tpu.memory_space<vmem>>, %arg6: memref<16x64xbf16, #tpu.memory_space<vmem>>, %arg7: memref<16x64xf32, #tpu.memory_space<vmem>>) attributes {dimension_semantics = [#tpu.dimension_semantics<parallel>, #tpu.dimension_semantics<parallel>, #tpu.dimension_semantics<arbitrary>], iteration_bounds = array<i64: 1, 1, 1>, scalar_prefetch = 0 : i64, scratch_operands = 1 : i64, tpu.core_type = #tpu.core_type<tc>, window_params = [{transform_indices = @transform_0, window_bounds = array<i64: 16, 32>}, {transform_indices = @transform_1, window_bounds = array<i64: 32, 64>}, {transform_indices = @transform_2, window_bounds = array<i64: 1, 64>}, {transform_indices = @transform_3, window_bounds = array<i64: 16, 64>}]} {
    %c0_i32 = arith.constant 0 : i32
    %0 = arith.cmpi eq, %arg2, %c0_i32 : i32
    %1 = arith.extui %0 : i1 to i32
    %c0_i32_0 = arith.constant 0 : i32
    %2 = arith.cmpi ne, %1, %c0_i32_0 : i32
    scf.if %2 {
      %cst_10 = arith.constant 0.000000e+00 : f32
      %12 = vector.broadcast %cst_10 : f32 to vector<16x64xf32>
      %c0_11 = arith.constant 0 : index
      %c0_12 = arith.constant 0 : index
      %13 = vector.load %arg7[%c0_11, %c0_12] : memref<16x64xf32, #tpu.memory_space<vmem>>, vector<16x64xf32>
      tpu.vector_store %arg7[%c0_11, %c0_12], %12 {strides = array<i32>} : memref<16x64xf32, #tpu.memory_space<vmem>>, vector<16x64xf32>,
    } else {
    }
    %c0 = arith.constant 0 : index
    %c0_1 = arith.constant 0 : index
    %3 = vector.load %arg7[%c0, %c0_1] : memref<16x64xf32, #tpu.memory_space<vmem>>, vector<16x64xf32>
    %c0_2 = arith.constant 0 : index
    %c0_3 = arith.constant 0 : index
    %4 = vector.load %arg3[%c0_2, %c0_3] : memref<16x32xbf16, #tpu.memory_space<vmem>>, vector<16x32xbf16>
    %c0_4 = arith.constant 0 : index
    %c0_5 = arith.constant 0 : index
    %5 = vector.load %arg4[%c0_4, %c0_5] : memref<32x64xbf16, #tpu.memory_space<vmem>>, vector<32x64xbf16>
    %cst = arith.constant dense<0.000000e+00> : vector<16x64xf32>
    %6 = tpu.matmul %4, %5, %cst {dimension_numbers = #tpu.dot_dimension_numbers<[1], [0], [0], [1], [0, 0, 1, 1], [], []>} : vector<16x32xbf16>, vector<32x64xbf16>, vector<16x64xf32> -> vector<16x64xf32>
    %7 = arith.addf %3, %6 : vector<16x64xf32>
    %c0_6 = arith.constant 0 : index
    %c0_7 = arith.constant 0 : index
    %8 = vector.load %arg7[%c0_6, %c0_7] : memref<16x64xf32, #tpu.memory_space<vmem>>, vector<16x64xf32>
    tpu.vector_store %arg7[%c0_6, %c0_7], %7 {strides = array<i32>} : memref<16x64xf32, #tpu.memory_space<vmem>>, vector<16x64xf32>,
    %c0_i32_8 = arith.constant 0 : i32
    %9 = arith.cmpi eq, %arg2, %c0_i32_8 : i32
    %10 = arith.extui %9 : i1 to i32
    %c0_i32_9 = arith.constant 0 : i32
    %11 = arith.cmpi ne, %10, %c0_i32_9 : i32
    scf.if %11 {
      %c0_10 = arith.constant 0 : index
      %c0_11 = arith.constant 0 : index
      %12 = vector.load %arg7[%c0_10, %c0_11] : memref<16x64xf32, #tpu.memory_space<vmem>>, vector<16x64xf32>
      %c0_12 = arith.constant 0 : index
      %c0_13 = arith.constant 0 : index
      %13 = vector.load %arg5[%c0_12, %c0_13] : memref<1x64xf32, #tpu.memory_space<vmem>>, vector<1x64xf32>
      %14 = vector.broadcast %13 : vector<1x64xf32> to vector<16x64xf32>
      %15 = arith.addf %12, %14 : vector<16x64xf32>
      %16 = arith.mulf %15, %15 : vector<16x64xf32>
      %17 = arith.mulf %15, %16 : vector<16x64xf32>
      %cst_14 = arith.constant 4.471500e-02 : f32
      %18 = vector.broadcast %cst_14 : f32 to vector<16x64xf32>
      %19 = arith.mulf %18, %17 : vector<16x64xf32>
      %20 = arith.addf %15, %19 : vector<16x64xf32>
      %cst_15 = arith.constant 0.797884583 : f32
      %21 = vector.broadcast %cst_15 : f32 to vector<16x64xf32>
      %22 = arith.mulf %21, %20 : vector<16x64xf32>
      %23 = math.tanh %22 : vector<16x64xf32>
      %cst_16 = arith.constant 1.000000e+00 : f32
      %24 = vector.broadcast %cst_16 : f32 to vector<16x64xf32>
      %25 = arith.addf %24, %23 : vector<16x64xf32>
      %cst_17 = arith.constant 5.000000e-01 : f32
      %26 = vector.broadcast %cst_17 : f32 to vector<16x64xf32>
      %27 = arith.mulf %26, %25 : vector<16x64xf32>
      %28 = arith.mulf %15, %27 : vector<16x64xf32>
      %29 = arith.truncf %28 : vector<16x64xf32> to vector<16x64xbf16>
      %c0_18 = arith.constant 0 : index
      %c0_19 = arith.constant 0 : index
      %30 = vector.load %arg6[%c0_18, %c0_19] : memref<16x64xbf16, #tpu.memory_space<vmem>>, vector<16x64xbf16>
      tpu.vector_store %arg6[%c0_18, %c0_19], %29 {strides = array<i32>} : memref<16x64xbf16, #tpu.memory_space<vmem>>, vector<16x64xbf16>,
    } else {
    }
    return
  }
  func.func @transform_0(%arg0: i32, %arg1: i32, %arg2: i32) -> (i32, i32) {
    %c0_i32 = arith.constant 0 : i32
    return %arg0, %arg2 : i32, i32
  }
  func.func @transform_1(%arg0: i32, %arg1: i32, %arg2: i32) -> (i32, i32) {
    %c0_i32 = arith.constant 0 : i32
    return %arg2, %arg1 : i32, i32
  }
  func.func @transform_2(%arg0: i32, %arg1: i32, %arg2: i32) -> (i32, i32) {
    %c0_i32 = arith.constant 0 : i32
    %c0_i32_0 = arith.constant 0 : i32
    return %c0_i32, %arg1 : i32, i32
  }
  func.func @transform_3(%arg0: i32, %arg1: i32, %arg2: i32) -> (i32, i32) {
    %c0_i32 = arith.constant 0 : i32
    return %arg0, %arg1 : i32, i32
  }
}

module attributes {stable_mosaic.version = 11 : i64} {
  func.func @_matmul_res_ln_kernel(%arg0: i32, %arg1: i32, %arg2: memref<16x64xbf16, #tpu.memory_space<vmem>>, %arg3: memref<64x32xbf16, #tpu.memory_space<vmem>>, %arg4: memref<1x32xf32, #tpu.memory_space<vmem>>, %arg5: memref<16x32xbf16, #tpu.memory_space<vmem>>, %arg6: memref<1x32xf32, #tpu.memory_space<vmem>>, %arg7: memref<1x32xf32, #tpu.memory_space<vmem>>, %arg8: memref<16x32xbf16, #tpu.memory_space<vmem>>, %arg9: memref<16x32xf32, #tpu.memory_space<vmem>>) attributes {dimension_semantics = [#tpu.dimension_semantics<parallel>, #tpu.dimension_semantics<arbitrary>], iteration_bounds = array<i64: 1, 1>, scalar_prefetch = 0 : i64, scratch_operands = 1 : i64, tpu.core_type = #tpu.core_type<tc>, window_params = [{transform_indices = @transform_0, window_bounds = array<i64: 16, 64>}, {transform_indices = @transform_1, window_bounds = array<i64: 64, 32>}, {pipeline_mode = #tpu.pipeline_mode<synchronous>, transform_indices = @transform_2, window_bounds = array<i64: 1, 32>}, {transform_indices = @transform_3, window_bounds = array<i64: 16, 32>}, {pipeline_mode = #tpu.pipeline_mode<synchronous>, transform_indices = @transform_4, window_bounds = array<i64: 1, 32>}, {pipeline_mode = #tpu.pipeline_mode<synchronous>, transform_indices = @transform_5, window_bounds = array<i64: 1, 32>}, {transform_indices = @transform_6, window_bounds = array<i64: 16, 32>}]} {
    %c0_i32 = arith.constant 0 : i32
    %0 = arith.cmpi eq, %arg1, %c0_i32 : i32
    %1 = arith.extui %0 : i1 to i32
    %c0_i32_0 = arith.constant 0 : i32
    %2 = arith.cmpi ne, %1, %c0_i32_0 : i32
    scf.if %2 {
      %cst_10 = arith.constant 0.000000e+00 : f32
      %12 = vector.broadcast %cst_10 : f32 to vector<16x32xf32>
      %c0_11 = arith.constant 0 : index
      %c0_12 = arith.constant 0 : index
      %13 = vector.load %arg9[%c0_11, %c0_12] : memref<16x32xf32, #tpu.memory_space<vmem>>, vector<16x32xf32>
      tpu.vector_store %arg9[%c0_11, %c0_12], %12 {strides = array<i32>} : memref<16x32xf32, #tpu.memory_space<vmem>>, vector<16x32xf32>,
    } else {
    }
    %c0 = arith.constant 0 : index
    %c0_1 = arith.constant 0 : index
    %3 = vector.load %arg9[%c0, %c0_1] : memref<16x32xf32, #tpu.memory_space<vmem>>, vector<16x32xf32>
    %c0_2 = arith.constant 0 : index
    %c0_3 = arith.constant 0 : index
    %4 = vector.load %arg2[%c0_2, %c0_3] : memref<16x64xbf16, #tpu.memory_space<vmem>>, vector<16x64xbf16>
    %c0_4 = arith.constant 0 : index
    %c0_5 = arith.constant 0 : index
    %5 = vector.load %arg3[%c0_4, %c0_5] : memref<64x32xbf16, #tpu.memory_space<vmem>>, vector<64x32xbf16>
    %cst = arith.constant dense<0.000000e+00> : vector<16x32xf32>
    %6 = tpu.matmul %4, %5, %cst {dimension_numbers = #tpu.dot_dimension_numbers<[1], [0], [0], [1], [0, 0, 1, 1], [], []>} : vector<16x64xbf16>, vector<64x32xbf16>, vector<16x32xf32> -> vector<16x32xf32>
    %7 = arith.addf %3, %6 : vector<16x32xf32>
    %c0_6 = arith.constant 0 : index
    %c0_7 = arith.constant 0 : index
    %8 = vector.load %arg9[%c0_6, %c0_7] : memref<16x32xf32, #tpu.memory_space<vmem>>, vector<16x32xf32>
    tpu.vector_store %arg9[%c0_6, %c0_7], %7 {strides = array<i32>} : memref<16x32xf32, #tpu.memory_space<vmem>>, vector<16x32xf32>,
    %c0_i32_8 = arith.constant 0 : i32
    %9 = arith.cmpi eq, %arg1, %c0_i32_8 : i32
    %10 = arith.extui %9 : i1 to i32
    %c0_i32_9 = arith.constant 0 : i32
    %11 = arith.cmpi ne, %10, %c0_i32_9 : i32
    scf.if %11 {
      %c0_10 = arith.constant 0 : index
      %c0_11 = arith.constant 0 : index
      %12 = vector.load %arg9[%c0_10, %c0_11] : memref<16x32xf32, #tpu.memory_space<vmem>>, vector<16x32xf32>
      %c0_12 = arith.constant 0 : index
      %c0_13 = arith.constant 0 : index
      %13 = vector.load %arg4[%c0_12, %c0_13] : memref<1x32xf32, #tpu.memory_space<vmem>>, vector<1x32xf32>
      %14 = vector.broadcast %13 : vector<1x32xf32> to vector<16x32xf32>
      %15 = arith.addf %12, %14 : vector<16x32xf32>
      %c0_14 = arith.constant 0 : index
      %c0_15 = arith.constant 0 : index
      %16 = vector.load %arg5[%c0_14, %c0_15] : memref<16x32xbf16, #tpu.memory_space<vmem>>, vector<16x32xbf16>
      %17 = arith.extf %16 : vector<16x32xbf16> to vector<16x32xf32>
      %18 = arith.addf %15, %17 : vector<16x32xf32>
      %cst_16 = arith.constant dense<0.000000e+00> : vector<16xf32>
      %19 = vector.multi_reduction <add>, %18, %cst_16 [1] : vector<16x32xf32> to vector<16xf32>
      %20 = vector.shape_cast %19 : vector<16xf32> to vector<16x1xf32>
      %cst_17 = arith.constant 3.200000e+01 : f32
      %21 = vector.broadcast %cst_17 : f32 to vector<16x1xf32>
      %22 = arith.divf %20, %21 : vector<16x1xf32>
      %23 = vector.broadcast %22 : vector<16x1xf32> to vector<16x32xf32>
      %24 = arith.subf %18, %23 : vector<16x32xf32>
      %25 = arith.mulf %24, %24 : vector<16x32xf32>
      %cst_18 = arith.constant dense<0.000000e+00> : vector<16xf32>
      %26 = vector.multi_reduction <add>, %25, %cst_18 [1] : vector<16x32xf32> to vector<16xf32>
      %27 = vector.shape_cast %26 : vector<16xf32> to vector<16x1xf32>
      %cst_19 = arith.constant 3.200000e+01 : f32
      %28 = vector.broadcast %cst_19 : f32 to vector<16x1xf32>
      %29 = arith.divf %27, %28 : vector<16x1xf32>
      %30 = vector.broadcast %22 : vector<16x1xf32> to vector<16x32xf32>
      %31 = arith.subf %18, %30 : vector<16x32xf32>
      %cst_20 = arith.constant 9.99999996E-13 : f32
      %32 = vector.broadcast %cst_20 : f32 to vector<16x1xf32>
      %33 = arith.addf %29, %32 : vector<16x1xf32>
      %34 = math.rsqrt %33 : vector<16x1xf32>
      %35 = vector.broadcast %34 : vector<16x1xf32> to vector<16x32xf32>
      %36 = arith.mulf %31, %35 : vector<16x32xf32>
      %c0_21 = arith.constant 0 : index
      %c0_22 = arith.constant 0 : index
      %37 = vector.load %arg6[%c0_21, %c0_22] : memref<1x32xf32, #tpu.memory_space<vmem>>, vector<1x32xf32>
      %38 = vector.broadcast %37 : vector<1x32xf32> to vector<16x32xf32>
      %39 = arith.mulf %36, %38 : vector<16x32xf32>
      %c0_23 = arith.constant 0 : index
      %c0_24 = arith.constant 0 : index
      %40 = vector.load %arg7[%c0_23, %c0_24] : memref<1x32xf32, #tpu.memory_space<vmem>>, vector<1x32xf32>
      %41 = vector.broadcast %40 : vector<1x32xf32> to vector<16x32xf32>
      %42 = arith.addf %39, %41 : vector<16x32xf32>
      %43 = arith.truncf %42 : vector<16x32xf32> to vector<16x32xbf16>
      %c0_25 = arith.constant 0 : index
      %c0_26 = arith.constant 0 : index
      %44 = vector.load %arg8[%c0_25, %c0_26] : memref<16x32xbf16, #tpu.memory_space<vmem>>, vector<16x32xbf16>
      tpu.vector_store %arg8[%c0_25, %c0_26], %43 {strides = array<i32>} : memref<16x32xbf16, #tpu.memory_space<vmem>>, vector<16x32xbf16>,
    } else {
    }
    return
  }
  func.func @transform_0(%arg0: i32, %arg1: i32) -> (i32, i32) {
    %c0_i32 = arith.constant 0 : i32
    return %arg0, %arg1 : i32, i32
  }
  func.func @transform_1(%arg0: i32, %arg1: i32) -> (i32, i32) {
    %c0_i32 = arith.constant 0 : i32
    %c0_i32_0 = arith.constant 0 : i32
    return %arg1, %c0_i32 : i32, i32
  }
  func.func @transform_2(%arg0: i32, %arg1: i32) -> (i32, i32) {
    %c0_i32 = arith.constant 0 : i32
    %c0_i32_0 = arith.constant 0 : i32
    %c0_i32_1 = arith.constant 0 : i32
    return %c0_i32, %c0_i32_0 : i32, i32
  }
  func.func @transform_3(%arg0: i32, %arg1: i32) -> (i32, i32) {
    %c0_i32 = arith.constant 0 : i32
    %c0_i32_0 = arith.constant 0 : i32
    return %arg0, %c0_i32 : i32, i32
  }
  func.func @transform_4(%arg0: i32, %arg1: i32) -> (i32, i32) {
    %c0_i32 = arith.constant 0 : i32
    %c0_i32_0 = arith.constant 0 : i32
    %c0_i32_1 = arith.constant 0 : i32
    return %c0_i32, %c0_i32_0 : i32, i32
  }
  func.func @transform_5(%arg0: i32, %arg1: i32) -> (i32, i32) {
    %c0_i32 = arith.constant 0 : i32
    %c0_i32_0 = arith.constant 0 : i32
    %c0_i32_1 = arith.constant 0 : i32
    return %c0_i32, %c0_i32_0 : i32, i32
  }
  func.func @transform_6(%arg0: i32, %arg1: i32) -> (i32, i32) {
    %c0_i32 = arith.constant 0 : i32
    %c0_i32_0 = arith.constant 0 : i32
    return %arg0, %c0_i32 : i32, i32
  }
}

module attributes {stable_mosaic.version = 11 : i64} {
  func.func @_pooler_head_kernel(%arg0: memref<2x32xbf16, #tpu.memory_space<vmem>>, %arg1: memref<32x32xbf16, #tpu.memory_space<vmem>>, %arg2: memref<1x32xf32, #tpu.memory_space<vmem>>, %arg3: memref<32x128xbf16, #tpu.memory_space<vmem>>, %arg4: memref<1x128xf32, #tpu.memory_space<vmem>>, %arg5: memref<2x128xf32, #tpu.memory_space<vmem>>) attributes {dimension_semantics = [], scalar_prefetch = 0 : i64, scratch_operands = 0 : i64, tpu.core_type = #tpu.core_type<tc>} {
    %c0 = arith.constant 0 : index
    %c0_0 = arith.constant 0 : index
    %0 = vector.load %arg0[%c0, %c0_0] : memref<2x32xbf16, #tpu.memory_space<vmem>>, vector<2x32xbf16>
    %c0_1 = arith.constant 0 : index
    %c0_2 = arith.constant 0 : index
    %1 = vector.load %arg1[%c0_1, %c0_2] : memref<32x32xbf16, #tpu.memory_space<vmem>>, vector<32x32xbf16>
    %cst = arith.constant dense<0.000000e+00> : vector<2x32xf32>
    %2 = tpu.matmul %0, %1, %cst {dimension_numbers = #tpu.dot_dimension_numbers<[1], [0], [0], [1], [0, 0, 1, 1], [], []>} : vector<2x32xbf16>, vector<32x32xbf16>, vector<2x32xf32> -> vector<2x32xf32>
    %c0_3 = arith.constant 0 : index
    %c0_4 = arith.constant 0 : index
    %3 = vector.load %arg2[%c0_3, %c0_4] : memref<1x32xf32, #tpu.memory_space<vmem>>, vector<1x32xf32>
    %4 = vector.broadcast %3 : vector<1x32xf32> to vector<2x32xf32>
    %5 = arith.addf %2, %4 : vector<2x32xf32>
    %6 = math.tanh %5 : vector<2x32xf32>
    %7 = arith.truncf %6 : vector<2x32xf32> to vector<2x32xbf16>
    %c0_5 = arith.constant 0 : index
    %c0_6 = arith.constant 0 : index
    %8 = vector.load %arg3[%c0_5, %c0_6] : memref<32x128xbf16, #tpu.memory_space<vmem>>, vector<32x128xbf16>
    %cst_7 = arith.constant dense<0.000000e+00> : vector<2x128xf32>
    %9 = tpu.matmul %7, %8, %cst_7 {dimension_numbers = #tpu.dot_dimension_numbers<[1], [0], [0], [1], [0, 0, 1, 1], [], []>} : vector<2x32xbf16>, vector<32x128xbf16>, vector<2x128xf32> -> vector<2x128xf32>
    %c0_8 = arith.constant 0 : index
    %c0_9 = arith.constant 0 : index
    %10 = vector.load %arg4[%c0_8, %c0_9] : memref<1x128xf32, #tpu.memory_space<vmem>>, vector<1x128xf32>
    %11 = vector.broadcast %10 : vector<1x128xf32> to vector<2x128xf32>
    %12 = arith.addf %9, %11 : vector<2x128xf32>
    %c0_10 = arith.constant 0 : index
    %c0_11 = arith.constant 0 : index
    %13 = vector.load %arg5[%c0_10, %c0_11] : memref<2x128xf32, #tpu.memory_space<vmem>>, vector<2x128xf32>
    tpu.vector_store %arg5[%c0_10, %c0_11], %12 {strides = array<i32>} : memref<2x128xf32, #tpu.memory_space<vmem>>, vector<2x128xf32>,
    return
  }
}

</mosaic_0001>

<bundles_post_ra>
// kernel: bert_classifier_forward.8
= control target key start
LH: loop header
LB: loop body
LE: loop exit
PB: predicated region body
PF: predicated region fallthrough
CT: control target
= control target key end

     0   :  { %vm19_vm0 = vcmask 785408   ;;  %v108_v1 = vmov 0.0   ;;  %vm47_vm1 = vcmask 261120   ;;  %vm83_vm2 = vcmask 781312   ;;  %s151_s1 = inlined_call_operand.vmem [shape: bf16[32,96], index: 1, kind: input, shape index: {}]   ;;  %s152_s2 = inlined_call_operand.vmem [shape: f32[1,96], index: 2, kind: input, shape index: {}]   ;;  %s153_s0 = inlined_call_operand.vmem [shape: bf16[16,32], index: 0, kind: input, shape index: {}]   ;;  %s154_s3 = inlined_call_operand.vmem [shape: bf16[16,96], index: 3, kind: output, shape index: {}]  }
   0x1   :  { %v105_v0 = vld [vmem:[%s151_s1 + $0x8] sm:$0xff]  ;;  %20 = vst.msk [vmem:[#allocation2] sm:$0xff] %vm19_vm0, %v108_v1  ;;  %v104_v2 = vld [vmem:[%s151_s1] sm:$0xff] }
   0x2   :  { %21 = vst.msk [vmem:[#allocation2 + $0x8] sm:$0xff] %vm19_vm0, %v108_v1  ;;  %57 = vmatpush.bf16.msra.mxu0 %v105_v0  ;;  %v103_v3 = vld [vmem:[%s153_s0] sm:$0xff] }
   0x3   :  { %v107_v8 = vld [vmem:[%s152_s2] ss:$0 sm:$0xff] }
   0x6   :  { %58 = vmatpush.bf16.msra.mxu0 %v104_v2 }
   0x8   :  { %v22_v4 = vld [vmem:[#allocation2] sm:$0xff] }
   0x9   :  { %102 = vmatmul.msk.bf16.vlgmr.msra.gmra.mxu0 %vm47_vm1, %v103_v3  ;;  %v23_v7 = vld [vmem:[#allocation2 + $0x8] sm:$0xff] }
  0x86   :  { %v60_v5 = vpop.f32.mrf.mxu0 }
  0x87   :  { %v65_v6 = vadd.f32 %v60_v5, %v22_v4 }
  0x89   :  { %68 = vst.msk [vmem:[#allocation2] sm:$0xff] %vm19_vm0, %v65_v6 }
  0x8e   :  { %v62_v9 = vpop.f32.mrf.mxu0 }
  0x8f   :  { %v66_v10 = vadd.f32 %v62_v9, %v23_v7 }
  0x90   :  { %v73_v11 = vld [vmem:[#allocation2] sm:$0xff] }
  0x91   :  { %v79_v12 = vadd.f32 %v107_v8, %v73_v11  ;;  %69 = vst.msk [vmem:[#allocation2 + $0x8] sm:$0xff] %vm19_vm0, %v66_v10 }
  0x93   :  { %v81_v13 = vpack.c.bf16 %v79_v12, %v79_v12 }
  0x95   :  { %84 = vst.msk [vmem:[%s154_s3] sm:$0xf] %vm83_vm2, %v81_v13 }
  0x98   :  { %v74_v14 = vld [vmem:[#allocation2 + $0x8] sm:$0xff] }
  0x99   :  { %v80_v15 = vadd.f32 %v107_v8, %v74_v14 }
  0x9b   :  { %v82_v16 = vpack.c.bf16 %v80_v15, %v80_v15 }
  0x9d   :  { %85 = vst.msk [vmem:[%s154_s3 + $0x4] sm:$0xf] %vm83_vm2, %v82_v16 }

// kernel: bert_classifier_forward.7
= control target key start
LH: loop header
LB: loop body
LE: loop exit
PB: predicated region body
PF: predicated region fallthrough
CT: control target
= control target key end

     0   :  { %s549_s18 = smov 0   ;;  %s551_s19 = smov 0   ;;  %s601_s0 = inlined_call_operand.vmem [shape: bf16[2,8,32], index: 0, kind: input, shape index: {}]   ;;  %s602_s1 = inlined_call_operand.vmem [shape: bf16[2,8,32], index: 1, kind: input, shape index: {}]   ;;  %s603_s2 = inlined_call_operand.vmem [shape: bf16[8,32], index: 2, kind: input, shape index: {}]   ;;  %s604_s3 = inlined_call_operand.vmem [shape: f32[1,32], index: 3, kind: input, shape index: {}]   ;;  %s605_s4 = inlined_call_operand.vmem [shape: f32[1,32], index: 4, kind: input, shape index: {}]   ;;  %s606_s5 = inlined_call_operand.vmem [shape: bf16[2,8,32], index: 5, kind: output, shape index: {}]  }
   0x1   :  { %s553_s20 = smov 0  }
   0x2 LB: > { %s27_s21 = sadd.s32 1, %s512_s19  ;;  %p457_p0 = scmp.ge.s32.totalorder %s516_s20, 1  ;;  %s516_s20 = sphi %s553_s20, %s15_s20   ;;  %s512_s19 = sphi %s551_s19, %s608_s19   ;;  %s508_s18 = sphi %s549_s18, %s607_s18  }
   0x3   : > { %p29_p1 = scmp.ge.s32.totalorder %s27_s21, 2  ;;  %p228_p2 = scmp.lt.s32.totalorder %s516_s20, 3 }
   0x5   : > { %s610_s21 = smov (%p29_p1, %s27_s21), 0  ;;  %p229_p3 = pnand %p457_p0, %p228_p2 }
   0x6   : > { %p271_p4 = scmp.lt.s32.totalorder (!%p229_p3), %s508_s18, 1 }
   0x7   : > { %232 = sbr.rel (%p229_p3) target bundleno = 294 (0x126), region = 40 }
   0xc   : > { %s612_s18 = smov (!%p271_p4, %s508_s18), 1  ;;  %v301_v0 = vld [vmem:[%s603_s2] sm:$0xf]  ;;  %vm304_vm0 = vcmask 261120   ;;  %v518_v9 = vmov 32.0   ;;  %vm345_vm5 = vcmask 257024  }
   0xd   : > { %s567_s22 = sshll.u32 %s612_s18, 2  ;;  %v302_v5 = vunpack.c.l.bf16 %v301_v0  ;;  %490 = vrcp.f32 %v518_v9  ;;  %v488_v30 = vld [vmem:[%s604_s3] ss:$0 sm:$0xff] }
   0xe   : > { %s277_s27 = scalar_lea.vmem %s601_s0, %s567_s22  ;;  %s284_s30 = scalar_lea.vmem %s602_s1, %s567_s22  ;;  %v489_v32 = vld [vmem:[%s605_s4] ss:$0 sm:$0xff] }
   0xf   : > { %v296_v1 = vld [vmem:[%s277_s27] sm:$0xf]  ;;  %s295_s12 = scalar_lea.vmem %s606_s5, %s567_s22 }
  0x10   : > { %v298_v2 = vld [vmem:[%s284_s30] sm:$0xf]  ;;  %v297_v3 = vunpack.c.l.bf16 %v296_v1 }
  0x11   : > { %v299_v4 = vunpack.c.l.bf16 %v298_v2 }
  0x13   : > { %v300_v6 = vadd.f32 %v299_v4, %v297_v3  ;;  %v491_v10 = vpop.eup %490 }
  0x14   : > { %v309_v11 = vmul.f32 32.0, %v491_v10  ;;  %vm313_vm1 = vweird.f32 %v491_v10 }
  0x15   : > { %v303_v7 = vadd.f32 %v302_v5, %v300_v6 }
  0x16   : > { %v310_v12 = vsub.f32 1.0, %v309_v11 }
  0x17   : > { %v305_v8 = vsel %vm304_vm0, %v303_v7, 0.0 }
  0x18   : > { %306 = vadd.xlane.f32.xlu0 %v305_v8  ;;  %v311_v13 = vmul.f32 %v491_v10, %v310_v12 }
  0x1a   : > { %v312_v14 = vadd.f32 %v491_v10, %v311_v13 }
  0x1c   : > { %v314_v15 = vsel %vm313_vm1, %v491_v10, %v312_v14 }
  0x8b   : > { %v307_v16 = vpop.xlane.xlu0 %306 }
  0x8c   : > { %v315_v17 = vmul.f32 %v314_v15, %v307_v16 }
  0x8e   : > { %v316_v18 = vsub.f32 %v303_v7, %v315_v17 }
  0x90   : > { %v317_v19 = vmul.f32 %v316_v18, %v316_v18 }
  0x92   : > { %v318_v20 = vsel %vm304_vm0, %v317_v19, 0.0 }
  0x93   : > { %319 = vadd.xlane.f32.xlu0 %v318_v20 }
 0x106   : > { %v320_v21 = vpop.xlane.xlu0 %319 }
 0x107   : > { %v321_v22 = vmul.f32 %v320_v21, %v314_v15 }
 0x109   : > { %v322_v23 = vadd.f32 1e-12, %v321_v22 }
 0x10b   : > { %492 = vrsqrt.f32 %v322_v23  ;;  %vm329_vm3 = vweird.f32 %v322_v23 }
 0x111   : > { %v493_v24 = vpop.eup %492 }
 0x112   : > { %v324_v25 = vmul.f32 %v493_v24, %v322_v23  ;;  %vm330_vm2 = vweird.f32 %v493_v24 }
 0x113   : > { %vm331_vm4 = vmor %vm329_vm3, %vm330_vm2 }
 0x114   : > { %v325_v26 = vmul.f32 %v493_v24, %v324_v25 }
 0x116   : > { %v326_v27 = vmul.f32 0.5, %v325_v26 }
 0x118   : > { %v327_v28 = vsub.f32 1.5, %v326_v27 }
 0x11a   : > { %v328_v29 = vmul.f32 %v493_v24, %v327_v28 }
 0x11c   : > { %v332_v31 = vsel %vm331_vm4, %v493_v24, %v328_v29 }
 0x11d   : > { %v333_v33 = vmul.f32 %v332_v31, %v316_v18 }
 0x11f   : > { %v338_v34 = vmul.f32 %v488_v30, %v333_v33 }
 0x121   : > { %v343_v35 = vadd.f32 %v489_v32, %v338_v34 }
 0x123   : > { %v344_v36 = vpack.c.bf16 %v343_v35, %v343_v35 }
 0x125   : > { %346 = vst.msk [vmem:[%s295_s12] sm:$0xf] %vm345_vm5, %v344_v36 }
 0x126 PF: > { %s15_s20 = sadd.s32 1, %s516_s20   ;;  %s607_s18 = smov %s512_s19 }
 0x127   : > { %p12_p5 = scmp.ge.s32.totalorder %s15_s20, 4   ;;  %s608_s19 = smov %s610_s21 }
 0x129   :  { %14 = sbr.rel (!%p12_p5) target bundleno = 2 (0x2), region = 76 }

// kernel: bert_classifier_forward.10
= control target key start
LH: loop header
LB: loop body
LE: loop exit
PB: predicated region body
PF: predicated region fallthrough
CT: control target
= control target key end

     0   :  { %vm28_vm0 = vcmask 261120   ;;  %v198_v1 = vmov 0.0   ;;  %v199_v22 = vmov 32.0   ;;  %vm160_vm6 = vcmask 257024   ;;  %s271_s1 = inlined_call_operand.vmem [shape: bf16[32,32], index: 1, kind: input, shape index: {}]   ;;  %s272_s0 = inlined_call_operand.vmem [shape: bf16[16,32], index: 0, kind: input, shape index: {}]   ;;  %s273_s2 = inlined_call_operand.vmem [shape: f32[1,32], index: 2, kind: input, shape index: {}]   ;;  %s274_s3 = inlined_call_operand.vmem [shape: bf16[16,32], index: 3, kind: input, shape index: {}]   ;;  %s275_s4 = inlined_call_operand.vmem [shape: f32[1,32], index: 4, kind: input, shape index: {}]   ;;  %s276_s5 = inlined_call_operand.vmem [shape: f32[1,32], index: 5, kind: input, shape index: {}]   ;;  %s277_s6 = inlined_call_operand.vmem [shape: bf16[16,32], index: 6, kind: output, shape index: {}]  }
   0x1   :  { %v182_v0 = vld [vmem:[%s271_s1 + $0x8] sm:$0xff]  ;;  %29 = vst.msk [vmem:[#allocation2] sm:$0xff] %vm28_vm0, %v198_v1  ;;  %v181_v2 = vld [vmem:[%s271_s1] sm:$0xff]  ;;  %192 = vrcp.f32 %v199_v22 }
   0x2   :  { %30 = vst.msk [vmem:[#allocation2 + $0x8] sm:$0xff] %vm28_vm0, %v198_v1  ;;  %66 = vmatpush.bf16.msra.mxu0 %v182_v0  ;;  %v180_v3 = vld [vmem:[%s272_s0] sm:$0xff] }
   0x3   :  { %v184_v8 = vld [vmem:[%s274_s3] sm:$0xff]  }
   0x4   :  { %v189_v9 = vld [vmem:[%s273_s2] ss:$0 sm:$0xff]  ;;  %v185_v12 = vunpack.c.l.bf16 %v184_v8  ;;  %v186_v17 = vunpack.c.h.bf16 %v184_v8 }
   0x5   :  { %v190_v53 = vld [vmem:[%s275_s4] ss:$0 sm:$0xff] }
   0x6   :  { %67 = vmatpush.bf16.msra.mxu0 %v181_v2  ;;  %v191_v56 = vld [vmem:[%s276_s5] ss:$0 sm:$0xff] }
   0x7   :  { %v193_v23 = vpop.eup %192 }
   0x8   :  { %v31_v4 = vld [vmem:[#allocation2] sm:$0xff]  ;;  %v102_v24 = vmul.f32 32.0, %v193_v23  ;;  %vm106_vm1 = vweird.f32 %v193_v23 }
   0x9   :  { %179 = vmatmul.msk.bf16.vlgmr.msra.gmra.mxu0 %vm28_vm0, %v180_v3  ;;  %v32_v7 = vld [vmem:[#allocation2 + $0x8] sm:$0xff] }
   0xa   :  { %v103_v25 = vsub.f32 1.0, %v102_v24 }
   0xc   :  { %v104_v26 = vmul.f32 %v193_v23, %v103_v25 }
   0xe   :  { %v105_v27 = vadd.f32 %v193_v23, %v104_v26 }
  0x10   :  { %v107_v28 = vsel %vm106_vm1, %v193_v23, %v105_v27 }
  0x86   :  { %v69_v5 = vpop.f32.mrf.mxu0 }
  0x87   :  { %v74_v6 = vadd.f32 %v69_v5, %v31_v4 }
  0x89   :  { %76 = vst.msk [vmem:[#allocation2] sm:$0xff] %vm28_vm0, %v74_v6 }
  0x8e   :  { %v71_v10 = vpop.f32.mrf.mxu0 }
  0x8f   :  { %v75_v11 = vadd.f32 %v71_v10, %v32_v7 }
  0x90   :  { %v81_v13 = vld [vmem:[#allocation2] sm:$0xff] }
  0x91   :  { %77 = vst.msk [vmem:[#allocation2 + $0x8] sm:$0xff] %vm28_vm0, %v75_v11  ;;  %v87_v14 = vadd.f32 %v189_v9, %v81_v13 }
  0x93   :  { %v93_v15 = vadd.f32 %v185_v12, %v87_v14 }
  0x95   :  { %v95_v16 = vsel %vm28_vm0, %v93_v15, 0.0 }
  0x96   :  { %96 = vadd.xlane.f32.xlu0 %v95_v16 }
  0x98   :  { %v82_v18 = vld [vmem:[#allocation2 + $0x8] sm:$0xff] }
  0x99   :  { %v88_v19 = vadd.f32 %v189_v9, %v82_v18 }
  0x9b   :  { %v94_v20 = vadd.f32 %v186_v17, %v88_v19 }
  0x9d   :  { %v98_v21 = vsel %vm28_vm0, %v94_v20, 0.0 }
  0x9e   :  { %99 = vadd.xlane.f32.xlu0 %v98_v21 }
 0x109   :  { %v97_v29 = vpop.xlane.xlu0 %96 }
 0x10a   :  { %v108_v30 = vmul.f32 %v107_v28, %v97_v29 }
 0x10c   :  { %v110_v31 = vsub.f32 %v93_v15, %v108_v30 }
 0x10e   :  { %v112_v32 = vmul.f32 %v110_v31, %v110_v31 }
 0x110   :  { %v114_v33 = vsel %vm28_vm0, %v112_v32, 0.0 }
 0x111   :  { %115 = vadd.xlane.f32.xlu1 %v114_v33  ;;  %v100_v34 = vpop.xlane.xlu0 %99 }
 0x112   :  { %v109_v35 = vmul.f32 %v107_v28, %v100_v34 }
 0x114   :  { %v111_v36 = vsub.f32 %v94_v20, %v109_v35 }
 0x116   :  { %v113_v37 = vmul.f32 %v111_v36, %v111_v36 }
 0x118   :  { %v117_v38 = vsel %vm28_vm0, %v113_v37, 0.0 }
 0x119   :  { %118 = vadd.xlane.f32.xlu1 %v117_v38 }
 0x184   :  { %v116_v39 = vpop.xlane.xlu1 %115 }
 0x185   :  { %v120_v40 = vmul.f32 %v116_v39, %v107_v28 }
 0x187   :  { %v122_v41 = vadd.f32 1e-12, %v120_v40 }
 0x189   :  { %194 = vrsqrt.f32 %v122_v41  ;;  %vm130_vm3 = vweird.f32 %v122_v41 }
 0x18c   :  { %v119_v42 = vpop.xlane.xlu1 %118 }
 0x18d   :  { %v121_v43 = vmul.f32 %v119_v42, %v107_v28 }
 0x18f   :  { %v195_v44 = vpop.eup %194  ;;  %v123_v45 = vadd.f32 1e-12, %v121_v43 }
 0x190   :  { %v125_v46 = vmul.f32 %v195_v44, %v122_v41  ;;  %vm131_vm2 = vweird.f32 %v195_v44 }
 0x191   :  { %196 = vrsqrt.f32 %v123_v45  ;;  %vm132_vm4 = vmor %vm130_vm3, %vm131_vm2  ;;  %vm140_vm7 = vweird.f32 %v123_v45 }
 0x192   :  { %v126_v47 = vmul.f32 %v195_v44, %v125_v46 }
 0x194   :  { %v127_v48 = vmul.f32 0.5, %v126_v47 }
 0x196   :  { %v128_v49 = vsub.f32 1.5, %v127_v48 }
 0x197   :  { %v197_v50 = vpop.eup %196 }
 0x198   :  { %v129_v51 = vmul.f32 %v195_v44, %v128_v49  ;;  %v135_v52 = vmul.f32 %v197_v50, %v123_v45  ;;  %vm141_vm5 = vweird.f32 %v197_v50 }
 0x199   :  { %vm142_vm8 = vmor %vm140_vm7, %vm141_vm5 }
 0x19a   :  { %v133_v54 = vsel %vm132_vm4, %v195_v44, %v129_v51  ;;  %v136_v55 = vmul.f32 %v197_v50, %v135_v52 }
 0x19b   :  { %v144_v57 = vmul.f32 %v133_v54, %v110_v31 }
 0x19c   :  { %v137_v58 = vmul.f32 0.5, %v136_v55 }
 0x19d   :  { %v150_v59 = vmul.f32 %v190_v53, %v144_v57 }
 0x19e   :  { %v138_v60 = vsub.f32 1.5, %v137_v58 }
 0x19f   :  { %v156_v61 = vadd.f32 %v191_v56, %v150_v59 }
 0x1a0   :  { %v139_v62 = vmul.f32 %v197_v50, %v138_v60 }
 0x1a1   :  { %v158_v63 = vpack.c.bf16 %v156_v61, %v156_v61 }
 0x1a2   :  { %v143_v0 = vsel %vm142_vm8, %v197_v50, %v139_v62 }
 0x1a3   :  { %161 = vst.msk [vmem:[%s277_s6] sm:$0xf] %vm160_vm6, %v158_v63  ;;  %v145_v1 = vmul.f32 %v143_v0, %v111_v36 }
 0x1a5   :  { %v151_v2 = vmul.f32 %v190_v53, %v145_v1 }
 0x1a7   :  { %v157_v3 = vadd.f32 %v191_v56, %v151_v2 }
 0x1a9   :  { %v159_v4 = vpack.c.bf16 %v157_v3, %v157_v3 }
 0x1ab   :  { %162 = vst.msk [vmem:[%s277_s6 + $0x4] sm:$0xf] %vm160_vm6, %v159_v4 }

// kernel: bert_classifier_forward.9
= control target key start
LH: loop header
LB: loop body
LE: loop exit
PB: predicated region body
PF: predicated region fallthrough
CT: control target
= control target key end

     0   :  { %s521_s15 = smov [#allocation3]   ;;  %s604_s0 = inlined_call_operand.vmem [shape: s32[2], index: 0, kind: input, shape index: {}]   ;;  %s605_s1 = inlined_call_operand.vmem [shape: bf16[2,8,96], index: 1, kind: input, shape index: {}, may-alias: {1,2}]   ;;  %s606_s2 = inlined_call_operand.vmem [shape: bf16[2,8,96], index: 2, kind: input, shape index: {}, may-alias: {1,2}]   ;;  %s607_s3 = inlined_call_operand.vmem [shape: bf16[2,8,32], index: 3, kind: output, shape index: {}]  }
   0x1   :  { %s9_s14 = sshll.u32 %s604_s0, 4  ;;  %s10_s14 = int_to_ptr.vmem [resolvable:$true] %s9_s14 }
   0x2   :  { %12 = dma.vmem_to_smem %s10_s14, 16, %s521_s15, [#allocation2] }
   0x3   :  { %507 = dma.done.wait [#allocation2], 16 }
   0x4   :  { %508 = vsyncadd [#allocation2], 4294967280 }
   0x5   :  { %15 = sfence }
   0x6   :  { %s552_s16 = smov 0   ;;  %s554_s17 = smov 0  }
   0x7   :  { %s556_s18 = smov 0  }
   0x8 LB: > { %s33_s0 = sadd.s32 1, %s515_s17  ;;  %p433_p0 = scmp.ge.s32.totalorder %s519_s18, 1  ;;  %s519_s18 = sphi %s556_s18, %s21_s18   ;;  %s515_s17 = sphi %s554_s17, %s609_s17   ;;  %s511_s16 = sphi %s552_s16, %s608_s16  }
   0x9   : > { %p35_p1 = scmp.ge.s32.totalorder %s33_s0, 2  ;;  %p148_p2 = scmp.lt.s32.totalorder %s519_s18, 3 }
   0xb   : > { %s611_s0 = smov (%p35_p1, %s33_s0), 0  ;;  %p149_p3 = pnand %p433_p0, %p148_p2 }
   0xc   : > { %p178_p4 = scmp.lt.s32.totalorder (!%p149_p3), %s511_s16, 1  ;;  %s522_s27 = smov (!%p149_p3), 80  }
   0xd   : > { %152 = sbr.rel (%p149_p3) target bundleno = 768 (0x300), region = 28  ;;  %s523_s28 = smov (!%p149_p3), 96  }
   0xe   : > { %s524_s29 = smov (!%p149_p3), 112   ;;  %s197_s30 = sld [smem:[#allocation3 + %s511_s16]] (!%p149_p3) }
   0xf   : > { %s526_s4 = smov (!%p149_p3), 48   ;;  %s527_s5 = smov (!%p149_p3), 64  }
  0x10   : > { %s528_s9 = smov (!%p149_p3), 16  }
  0x12   : > { %s179_s19 = scalar_select %p178_p4, %s511_s16, 1  ;;  %vm210_vm0 = vcmask 130048   ;;  %v198_v15 = vlaneseq  ;;  %v525_v19 = vmov -1e+09   ;;  %vm232_vm2 = vcmask 64512  }
  0x13   : > { %vm250_vm3 = vcmask 1043456   ;;  %vm268_vm4 = vcmask 125952   ;;  %vm341_vm5 = vcmask 257152  }
  0x14   : > { %s574_s20 = sshll.u32 %s179_s19, 2  ;;  %v199_v16 = vand.u32 127, %v198_v15  ;;  %v200_v17 = vstv %s197_s30 }
  0x15   : > { %s188_s23 = scalar_lea.vmem %s606_s2, %s574_s20  ;;  %s184_s26 = scalar_lea.vmem %s605_s1, %s574_s20 }
  0x16   : > { %v271_v0 = vld [vmem:[%s188_s23] sm:$0xf]  ;;  %vm201_vm1 = vcmp.lt.s32.totalorder %v199_v16, %v200_v17  ;;  %s195_s8 = scalar_lea.vmem %s607_s3, %s574_s20 }
  0x17   : > { %v204_v1 = vld [vmem:[%s188_s23] sm:$0xf]  ;;  %v278_v2 = vunpack.c.l.b16 %v271_v0  ;;  %v202_v20 = vsel %vm201_vm1, 0.0, %v525_v19 }
  0x18   : > { %v206_v3 = vunpack.c.l.b16 %v204_v1  ;;  %v270_v4 = vld [vmem:[%s184_s26] sm:$0xf] }
  0x19   : > { %v279_v5 = vpack.c.b16 %v278_v2, %v278_v2  ;;  %v273_v7 = vunpack.c.l.b16 %v270_v4  ;;  %v203_v13 = vld [vmem:[%s184_s26] sm:$0xf] }
  0x1a   : > { %v207_v6 = vpack.c.b16 %v206_v3, %v206_v3 }
  0x1b   : > { %280 = vrot.lane.b32.xlu0 %v279_v5, %s522_s27  ;;  %v274_v8 = vpack.c.b16 %v273_v7, %v273_v7 }
  0x1c   : > { %208 = vrot.lane.b32.xlu1 %v207_v6, %s523_s28 }
  0x23   : > { %275 = vrot.lane.b32.xlu0 %v274_v8, %s524_s29 }
  0x2b   : > { %315 = vrot.lane.b32.xlu0 %v279_v5, %s526_s4 }
  0x33   : > { %245 = vrot.lane.b32.xlu0 %v207_v6, %s527_s5 }
  0x8d   : > { %v281_v9 = vpop.permute.xlu0 %280 }
  0x8e   : > { %v209_v10 = vpop.permute.xlu1 %208  ;;  %v286_v12 = vsel %vm210_vm0, %v281_v9, 0 }
  0x8f   : > { %v215_v11 = vsel %vm210_vm0, %v209_v10, 0  ;;  %295 = vmatpush.bf16.xpose.msra.mxu2 %v286_v12 }
  0x90   : > { %224 = vmatpush.bf16.xpose.msra.mxu0 %v215_v11 }
  0x95   : > { %v276_v14 = vpop.permute.xlu0 %275 }
  0x96   : > { %439 = vmatmul.msk.bf16.vlgmr.msra.gmra.mxu2 %vm210_vm0, %v276_v14 }
  0x97   : > { %437 = vmatmul.msk.bf16.vlgmr.msra.gmra.mxu0 %vm210_vm0, %v203_v13 }
  0x9d   : > { %v316_v40 = vpop.permute.xlu0 %315 }
  0x9e   : > { %v321_v41 = vsel %vm250_vm3, %v316_v40, 0 }
  0x9f   : > { %330 = vmatpush.bf16.msra.mxu3 %v321_v41 }
  0xa5   : > { %v246_v42 = vpop.permute.xlu0 %245 }
  0xa6   : > { %v252_v43 = vsel %vm250_vm3, %v246_v42, 0 }
  0xa7   : > { %261 = vmatpush.bf16.msra.mxu1 %v252_v43 }
 0x114   : > { %v226_v18 = vpop.f32.mrf.mxu0 }
 0x115   : > { %v230_v21 = vmul.f32 0.25, %v226_v18 }
 0x117   : > { %v231_v22 = vadd.f32 %v230_v21, %v202_v20 }
 0x119   : > { %v233_v23 = vsel %vm232_vm2, %v231_v22, -inf  ;;  %v297_v24 = vpop.f32.mrf.mxu2 }
 0x11a   : > { %234 = vmax.xlane.f32.xlu2 %v233_v23  ;;  %v301_v25 = vmul.f32 0.25, %v297_v24 }
 0x11c   : > { %v228_v26 = vpop.f32.mrf.mxu0  ;;  %v302_v27 = vadd.f32 %v301_v25, %v202_v20 }
 0x11e   : > { %v303_v28 = vsel %vm232_vm2, %v302_v27, -inf }
 0x11f   : > { %304 = vmax.xlane.f32.xlu1 %v303_v28 }
 0x121   : > { %v299_v29 = vpop.f32.mrf.mxu2 }
 0x18d   : > { %v235_v30 = vpop.xlane.xlu2 %234 }
 0x18e   : > { %v236_v33 = vsub.f32 %v231_v22, %v235_v30 }
 0x190   : > { %v237_v35 = vmul.f32 1.442695, %v236_v33 }
 0x192   : > { %v305_v31 = vpop.xlane.xlu1 %304 }
 0x193   : > { %v306_v32 = vsub.f32 %v302_v27, %v305_v31 }
 0x195   : > { %v307_v34 = vmul.f32 1.442695, %v306_v32 }
 0x197   : > { %475 = vpow2.f32 %v307_v34 }
 0x198   : > { %477 = vpow2.f32 %v237_v35 }
 0x19d   : > { %v476_v36 = vpop.eup %475 }
 0x19e   : > { %v309_v37 = vsel %vm232_vm2, %v476_v36, 0.0  ;;  %v478_v38 = vpop.eup %477 }
 0x19f   : > { %310 = vadd.xlane.f32.xlu2 %v309_v37  ;;  %v239_v39 = vsel %vm232_vm2, %v478_v38, 0.0 }
 0x1a7   : > { %240 = vadd.xlane.f32.xlu2 %v239_v39 }
 0x212   : > { %v311_v44 = vpop.xlane.xlu2 %310 }
 0x213   : > { %479 = vrcp.f32 %v311_v44 }
 0x219   : > { %v480_v45 = vpop.eup %479 }
 0x21a   : > { %v241_v46 = vpop.xlane.xlu2 %240  ;;  %v313_v47 = vmul.f32 %v480_v45, %v476_v36 }
 0x21b   : > { %481 = vrcp.f32 %v241_v46 }
 0x21c   : > { %v314_v48 = vpack.c.bf16 %v313_v47, %v313_v47 }
 0x21e   : > { %440 = vmatmul.msk.bf16.vlgmr.msra.gmra.mxu3 %vm232_vm2, %v314_v48 }
 0x221   : > { %v482_v49 = vpop.eup %481 }
 0x222   : > { %v243_v50 = vmul.f32 %v482_v49, %v478_v38 }
 0x224   : > { %v244_v51 = vpack.c.bf16 %v243_v50, %v243_v50 }
 0x226   : > { %438 = vmatmul.msk.bf16.vlgmr.msra.gmra.mxu1 %vm232_vm2, %v244_v51 }
 0x2a1   : > { %v332_v52 = vpop.f32.mrf.mxu3 }
 0x2a2   : > { %v336_v53 = vpack.c.bf16 %v332_v52, %v332_v52 }
 0x2a3   : > { %v263_v54 = vpop.f32.mrf.mxu1 }
 0x2a4   : > { %v267_v55 = vpack.c.bf16 %v263_v54, %v263_v54  ;;  %338 = vrot.lane.b32.xlu2 %v336_v53, %s528_s9 }
 0x2a6   : > { %269 = vst.msk [vmem:[%s195_s8] sm:$0xf] %vm268_vm4, %v267_v55 }
 0x2a9   : > { %v334_v56 = vpop.f32.mrf.mxu3 }
 0x2ab   : > { %v265_v57 = vpop.f32.mrf.mxu1 }
 0x2fe   : > { %v339_v58 = vpop.permute.xlu2 %338 }
 0x2ff   : > { %342 = vst.msk [vmem:[%s195_s8] sm:$0xf] %vm341_vm5, %v339_v58 }
 0x300 PF: > { %s21_s18 = sadd.s32 1, %s519_s18   ;;  %s608_s16 = smov %s515_s17 }
 0x301   : > { %p18_p5 = scmp.ge.s32.totalorder %s21_s18, 4   ;;  %s609_s17 = smov %s611_s0 }
 0x303   :  { %20 = sbr.rel (!%p18_p5) target bundleno = 8 (0x8), region = 61 }

// kernel: bert_classifier_forward.11
= control target key start
LH: loop header
LB: loop body
LE: loop exit
PB: predicated region body
PF: predicated region fallthrough
CT: control target
= control target key end

     0   :  { %vm19_vm0 = vcmask 523264   ;;  %v130_v1 = vmov 0.0   ;;  %vm47_vm1 = vcmask 261120   ;;  %vm101_vm2 = vcmask 519168   ;;  %s173_s1 = inlined_call_operand.vmem [shape: bf16[32,64], index: 1, kind: input, shape index: {}]   ;;  %s174_s2 = inlined_call_operand.vmem [shape: f32[1,64], index: 2, kind: input, shape index: {}]   ;;  %s175_s0 = inlined_call_operand.vmem [shape: bf16[16,32], index: 0, kind: input, shape index: {}]   ;;  %s176_s3 = inlined_call_operand.vmem [shape: bf16[16,64], index: 3, kind: output, shape index: {}]  }
   0x1   :  { %v123_v0 = vld [vmem:[%s173_s1 + $0x8] sm:$0xff]  ;;  %20 = vst.msk [vmem:[#allocation2] sm:$0xff] %vm19_vm0, %v130_v1  ;;  %v122_v2 = vld [vmem:[%s173_s1] sm:$0xff] }
   0x2   :  { %21 = vst.msk [vmem:[#allocation2 + $0x8] sm:$0xff] %vm19_vm0, %v130_v1  ;;  %57 = vmatpush.bf16.msra.mxu0 %v123_v0  ;;  %v121_v3 = vld [vmem:[%s175_s0] sm:$0xff] }
   0x3   :  { %v125_v8 = vld [vmem:[%s174_s2] ss:$0 sm:$0xff] }
   0x6   :  { %58 = vmatpush.bf16.msra.mxu0 %v122_v2 }
   0x8   :  { %v22_v4 = vld [vmem:[#allocation2] sm:$0xff] }
   0x9   :  { %120 = vmatmul.msk.bf16.vlgmr.msra.gmra.mxu0 %vm47_vm1, %v121_v3  ;;  %v23_v7 = vld [vmem:[#allocation2 + $0x8] sm:$0xff] }
  0x86   :  { %v60_v5 = vpop.f32.mrf.mxu0 }
  0x87   :  { %v65_v6 = vadd.f32 %v60_v5, %v22_v4 }
  0x89   :  { %68 = vst.msk [vmem:[#allocation2] sm:$0xff] %vm19_vm0, %v65_v6 }
  0x8e   :  { %v62_v9 = vpop.f32.mrf.mxu0 }
  0x8f   :  { %v66_v10 = vadd.f32 %v62_v9, %v23_v7 }
  0x90   :  { %v73_v11 = vld [vmem:[#allocation2] sm:$0xff] }
  0x91   :  { %v79_v12 = vadd.f32 %v125_v8, %v73_v11  ;;  %69 = vst.msk [vmem:[#allocation2 + $0x8] sm:$0xff] %vm19_vm0, %v66_v10 }
  0x93   :  { %v81_v13 = vmul.f32 %v79_v12, %v79_v12 }
  0x95   :  { %v83_v14 = vmul.f32 %v81_v13, %v79_v12 }
  0x97   :  { %v85_v15 = vmul.f32 0.044715, %v83_v14 }
  0x98   :  { %v74_v16 = vld [vmem:[#allocation2 + $0x8] sm:$0xff] }
  0x99   :  { %v87_v17 = vadd.f32 %v85_v15, %v79_v12  ;;  %v80_v18 = vadd.f32 %v125_v8, %v74_v16 }
  0x9b   :  { %v89_v19 = vmul.f32 0.7978846, %v87_v17  ;;  %v82_v20 = vmul.f32 %v80_v18, %v80_v18 }
  0x9d   :  { %126 = vtanh.f32 %v89_v19  ;;  %v84_v21 = vmul.f32 %v82_v20, %v80_v18 }
  0x9f   :  { %v86_v22 = vmul.f32 0.044715, %v84_v21 }
  0xa1   :  { %v88_v23 = vadd.f32 %v86_v22, %v80_v18 }
  0xa3   :  { %v127_v24 = vpop.eup %126  ;;  %v90_v25 = vmul.f32 0.7978846, %v88_v23 }
  0xa4   :  { %v93_v26 = vadd.f32 1.0, %v127_v24 }
  0xa5   :  { %128 = vtanh.f32 %v90_v25 }
  0xa6   :  { %v95_v27 = vmul.f32 0.5, %v93_v26 }
  0xa8   :  { %v97_v28 = vmul.f32 %v95_v27, %v79_v12 }
  0xaa   :  { %v99_v29 = vpack.c.bf16 %v97_v28, %v97_v28 }
  0xab   :  { %v129_v30 = vpop.eup %128 }
  0xac   :  { %102 = vst.msk [vmem:[%s176_s3] sm:$0xf] %vm101_vm2, %v99_v29  ;;  %v94_v31 = vadd.f32 1.0, %v129_v30 }
  0xae   :  { %v96_v32 = vmul.f32 0.5, %v94_v31 }
  0xb0   :  { %v98_v33 = vmul.f32 %v96_v32, %v80_v18 }
  0xb2   :  { %v100_v34 = vpack.c.bf16 %v98_v33, %v98_v33 }
  0xb4   :  { %103 = vst.msk [vmem:[%s176_s3 + $0x4] sm:$0xf] %vm101_vm2, %v100_v34 }

// kernel: bert_classifier_forward.13
= control target key start
LH: loop header
LB: loop body
LE: loop exit
PB: predicated region body
PF: predicated region fallthrough
CT: control target
= control target key end

     0   :  { %s223_s0 = inlined_call_operand.vmem [shape: bf16[2,32], index: 0, kind: input, shape index: {}]   ;;  %s224_s1 = inlined_call_operand.vmem [shape: bf16[32,32], index: 1, kind: input, shape index: {}]   ;;  %s225_s2 = inlined_call_operand.vmem [shape: f32[1,32], index: 2, kind: input, shape index: {}]   ;;  %s226_s3 = inlined_call_operand.vmem [shape: bf16[32,128], index: 3, kind: input, shape index: {}]   ;;  %s227_s4 = inlined_call_operand.vmem [shape: f32[1,128], index: 4, kind: input, shape index: {}]   ;;  %s228_s5 = inlined_call_operand.hbm [shape: f32[2,128], index: 5, kind: output, shape index: {}]  }
   0x1   :  { %v134_v0 = vld [vmem:[%s224_s1 + $0x8] sm:$0xff]  ;;  %v133_v1 = vld [vmem:[%s224_s1] sm:$0xff] }
   0x2   :  { %53 = vmatpush.bf16.msra.mxu0 %v134_v0 }
   0x3   :  { %10 = vsyncpa [#allocation3], 0  ;;  %v22_v2 = vld [vmem:[%s223_s0] sm:$0x1]  ;;  %vm43_vm0 = vcmask 261120   ;;  %v136_v3 = vld [vmem:[%s226_s3 + $0x8] sm:$0xff] }
   0x4   :  { %91 = vmatpush.bf16.msra.mxu1 %v136_v3  ;;  %v135_v4 = vld [vmem:[%s226_s3] sm:$0xff]  ;;  %s168_s30 = smov [#allocation2]   ;;  %s106_s8 = sshll.u32 %s228_s5, 4  ;;  %s107_s8 = int_to_ptr.hbm [resolvable:$true] %s106_s8 }
   0x5   :  { %v138_v5 = vld [vmem:[%s225_s2] ss:$0 sm:$0xff]  ;;  %s104_s6 = sshll.u32 %s168_s30, 4  ;;  %s105_s6 = int_to_ptr.vmem [resolvable:$true] %s104_s6 }
   0x6   :  { %54 = vmatpush.bf16.msra.mxu0 %v133_v1  ;;  %v139_v11 = vld [vmem:[%s227_s4] ss:$0 sm:$0xff] }
   0x8   :  { %92 = vmatpush.bf16.msra.mxu1 %v135_v4 }
   0x9   :  { %123 = vmatmul.msk.bf16.vlgmr.msra.gmra.mxu0 %vm43_vm0, %v22_v2 }
  0x86   :  { %v56_v6 = vpop.f32.mrf.mxu0 }
  0x87   :  { %v57_v7 = vadd.f32 %v138_v5, %v56_v6 }
  0x89   :  { %140 = vtanh.f32 %v57_v7 }
  0x8e   :  { %v58_v8 = vpop.f32.mrf.mxu0 }
  0x8f   :  { %v141_v9 = vpop.eup %140 }
  0x90   :  { %v61_v10 = vpack.c.bf16 %v141_v9, %v141_v9 }
  0x92   :  { %132 = vmatmul.msk.bf16.vlgmr.msra.gmra.mxu1 %vm43_vm0, %v61_v10 }
 0x10f   :  { %v94_v12 = vpop.f32.mrf.mxu1 }
 0x110   :  { %v95_v13 = vadd.f32 %v139_v11, %v94_v12 }
 0x112   :  { %98 = vst [vmem:[#allocation2] sm:$0x3] %v95_v13 }
 0x113   :  { %109 = dma.vmem_to_hbm [thread:$0]  %s105_s6, 32, %s107_s8, [#allocation3]  }
 0x117   :  { %v96_v14 = vpop.f32.mrf.mxu1 }
 0x118   :  { %166 = dma.done.wait [#allocation3], 32  }
 0x119   :  { %167 = vsyncadd [#allocation3], 4294967264 }
 0x11a   :  { %114 = vsyncpa [#allocation3], 1 }

// kernel: bert_classifier_forward.12
= control target key start
LH: loop header
LB: loop body
LE: loop exit
PB: predicated region body
PF: predicated region fallthrough
CT: control target
= control target key end

     0   :  { %vm28_vm0 = vcmask 261120   ;;  %v225_v1 = vmov 0.0   ;;  %vm72_vm1 = vcmask 523264   ;;  %v226_v24 = vmov 32.0   ;;  %s303_s1 = inlined_call_operand.vmem [shape: bf16[64,32], index: 1, kind: input, shape index: {}]   ;;  %s304_s0 = inlined_call_operand.vmem [shape: bf16[16,64], index: 0, kind: input, shape index: {}]   ;;  %s305_s2 = inlined_call_operand.vmem [shape: f32[1,32], index: 2, kind: input, shape index: {}]   ;;  %s306_s3 = inlined_call_operand.vmem [shape: bf16[16,32], index: 3, kind: input, shape index: {}]   ;;  %s307_s4 = inlined_call_operand.vmem [shape: f32[1,32], index: 4, kind: input, shape index: {}]   ;;  %s308_s5 = inlined_call_operand.vmem [shape: f32[1,32], index: 5, kind: input, shape index: {}]   ;;  %s309_s6 = inlined_call_operand.vmem [shape: bf16[16,32], index: 6, kind: output, shape index: {}]  }
   0x1   :  { %v209_v0 = vld [vmem:[%s303_s1 + $0x18] sm:$0xff]  ;;  %29 = vst.msk [vmem:[#allocation2] sm:$0xff] %vm28_vm0, %v225_v1  ;;  %v208_v2 = vld [vmem:[%s303_s1 + $0x10] sm:$0xff]  ;;  %v207_v3 = vld [vmem:[%s303_s1 + $0x8] sm:$0xff]  ;;  %219 = vrcp.f32 %v226_v24  ;;  %vm177_vm7 = vcmask 257024  }
   0x2   :  { %30 = vst.msk [vmem:[#allocation2 + $0x8] sm:$0xff] %vm28_vm0, %v225_v1  ;;  %80 = vmatpush.bf16.msra.mxu0 %v209_v0  ;;  %v206_v4 = vld [vmem:[%s303_s1] sm:$0xff] }
   0x3   :  { %v205_v5 = vld [vmem:[%s304_s0] sm:$0xff] }
   0x4   :  { %v211_v10 = vld [vmem:[%s306_s3] sm:$0xff]  }
   0x5   :  { %v216_v11 = vld [vmem:[%s305_s2] ss:$0 sm:$0xff]  ;;  %v212_v14 = vunpack.c.l.bf16 %v211_v10  ;;  %v213_v19 = vunpack.c.h.bf16 %v211_v10 }
   0x6   :  { %81 = vmatpush.bf16.msra.mxu0 %v208_v2  ;;  %v217_v55 = vld [vmem:[%s307_s4] ss:$0 sm:$0xff] }
   0x7   :  { %v220_v25 = vpop.eup %219  ;;  %v218_v58 = vld [vmem:[%s308_s5] ss:$0 sm:$0xff] }
   0x8   :  { %v31_v6 = vld [vmem:[#allocation2] sm:$0xff]  ;;  %v119_v26 = vmul.f32 32.0, %v220_v25  ;;  %vm123_vm2 = vweird.f32 %v220_v25 }
   0x9   :  { %v32_v9 = vld [vmem:[#allocation2 + $0x8] sm:$0xff] }
   0xa   :  { %82 = vmatpush.bf16.msra.mxu0 %v207_v3  ;;  %v120_v27 = vsub.f32 1.0, %v119_v26 }
   0xc   :  { %v121_v28 = vmul.f32 %v220_v25, %v120_v27 }
   0xe   :  { %83 = vmatpush.bf16.msra.mxu0 %v206_v4  ;;  %v122_v29 = vadd.f32 %v220_v25, %v121_v28 }
  0x10   :  { %v124_v30 = vsel %vm123_vm2, %v220_v25, %v122_v29 }
  0x11   :  { %204 = vmatmul.msk.bf16.vlgmr.msra.gmra.mxu0 %vm72_vm1, %v205_v5 }
  0x8e   :  { %v85_v7 = vpop.f32.mrf.mxu0 }
  0x8f   :  { %v90_v8 = vadd.f32 %v85_v7, %v31_v6 }
  0x91   :  { %93 = vst.msk [vmem:[#allocation2] sm:$0xff] %vm28_vm0, %v90_v8 }
  0x96   :  { %v87_v12 = vpop.f32.mrf.mxu0 }
  0x97   :  { %v91_v13 = vadd.f32 %v87_v12, %v32_v9 }
  0x98   :  { %v98_v15 = vld [vmem:[#allocation2] sm:$0xff] }
  0x99   :  { %94 = vst.msk [vmem:[#allocation2 + $0x8] sm:$0xff] %vm28_vm0, %v91_v13  ;;  %v104_v16 = vadd.f32 %v216_v11, %v98_v15 }
  0x9b   :  { %v110_v17 = vadd.f32 %v212_v14, %v104_v16 }
  0x9d   :  { %v112_v18 = vsel %vm28_vm0, %v110_v17, 0.0 }
  0x9e   :  { %113 = vadd.xlane.f32.xlu0 %v112_v18 }
  0xa0   :  { %v99_v20 = vld [vmem:[#allocation2 + $0x8] sm:$0xff] }
  0xa1   :  { %v105_v21 = vadd.f32 %v216_v11, %v99_v20 }
  0xa3   :  { %v111_v22 = vadd.f32 %v213_v19, %v105_v21 }
  0xa5   :  { %v115_v23 = vsel %vm28_vm0, %v111_v22, 0.0 }
  0xa6   :  { %116 = vadd.xlane.f32.xlu0 %v115_v23 }
 0x111   :  { %v114_v31 = vpop.xlane.xlu0 %113 }
 0x112   :  { %v125_v32 = vmul.f32 %v124_v30, %v114_v31 }
 0x114   :  { %v127_v33 = vsub.f32 %v110_v17, %v125_v32 }
 0x116   :  { %v129_v34 = vmul.f32 %v127_v33, %v127_v33 }
 0x118   :  { %v131_v35 = vsel %vm28_vm0, %v129_v34, 0.0 }
 0x119   :  { %132 = vadd.xlane.f32.xlu1 %v131_v35  ;;  %v117_v36 = vpop.xlane.xlu0 %116 }
 0x11a   :  { %v126_v37 = vmul.f32 %v124_v30, %v117_v36 }
 0x11c   :  { %v128_v38 = vsub.f32 %v111_v22, %v126_v37 }
 0x11e   :  { %v130_v39 = vmul.f32 %v128_v38, %v128_v38 }
 0x120   :  { %v134_v40 = vsel %vm28_vm0, %v130_v39, 0.0 }
 0x121   :  { %135 = vadd.xlane.f32.xlu1 %v134_v40 }
 0x18c   :  { %v133_v41 = vpop.xlane.xlu1 %132 }
 0x18d   :  { %v137_v42 = vmul.f32 %v133_v41, %v124_v30 }
 0x18f   :  { %v139_v43 = vadd.f32 1e-12, %v137_v42 }
 0x191   :  { %221 = vrsqrt.f32 %v139_v43  ;;  %vm147_vm4 = vweird.f32 %v139_v43 }
 0x194   :  { %v136_v44 = vpop.xlane.xlu1 %135 }
 0x195   :  { %v138_v45 = vmul.f32 %v136_v44, %v124_v30 }
 0x197   :  { %v222_v46 = vpop.eup %221  ;;  %v140_v47 = vadd.f32 1e-12, %v138_v45 }
 0x198   :  { %v142_v48 = vmul.f32 %v222_v46, %v139_v43  ;;  %vm148_vm3 = vweird.f32 %v222_v46 }
 0x199   :  { %223 = vrsqrt.f32 %v140_v47  ;;  %vm149_vm5 = vmor %vm147_vm4, %vm148_vm3  ;;  %vm157_vm8 = vweird.f32 %v140_v47 }
 0x19a   :  { %v143_v49 = vmul.f32 %v222_v46, %v142_v48 }
 0x19c   :  { %v144_v50 = vmul.f32 0.5, %v143_v49 }
 0x19e   :  { %v145_v51 = vsub.f32 1.5, %v144_v50 }
 0x19f   :  { %v224_v52 = vpop.eup %223 }
 0x1a0   :  { %v146_v53 = vmul.f32 %v222_v46, %v145_v51  ;;  %v152_v54 = vmul.f32 %v224_v52, %v140_v47  ;;  %vm158_vm6 = vweird.f32 %v224_v52 }
 0x1a1   :  { %vm159_vm9 = vmor %vm157_vm8, %vm158_vm6 }
 0x1a2   :  { %v150_v56 = vsel %vm149_vm5, %v222_v46, %v146_v53  ;;  %v153_v57 = vmul.f32 %v224_v52, %v152_v54 }
 0x1a3   :  { %v161_v59 = vmul.f32 %v150_v56, %v127_v33 }
 0x1a4   :  { %v154_v60 = vmul.f32 0.5, %v153_v57 }
 0x1a5   :  { %v167_v61 = vmul.f32 %v217_v55, %v161_v59 }
 0x1a6   :  { %v155_v62 = vsub.f32 1.5, %v154_v60 }
 0x1a7   :  { %v173_v63 = vadd.f32 %v218_v58, %v167_v61 }
 0x1a8   :  { %v156_v0 = vmul.f32 %v224_v52, %v155_v62 }
 0x1a9   :  { %v175_v1 = vpack.c.bf16 %v173_v63, %v173_v63 }
 0x1aa   :  { %v160_v2 = vsel %vm159_vm9, %v224_v52, %v156_v0 }
 0x1ab   :  { %178 = vst.msk [vmem:[%s309_s6] sm:$0xf] %vm177_vm7, %v175_v1  ;;  %v162_v3 = vmul.f32 %v160_v2, %v128_v38 }
 0x1ad   :  { %v168_v4 = vmul.f32 %v217_v55, %v162_v3 }
 0x1af   :  { %v174_v5 = vadd.f32 %v218_v58, %v168_v4 }
 0x1b1   :  { %v176_v6 = vpack.c.bf16 %v174_v5, %v174_v5 }
 0x1b3   :  { %179 = vst.msk [vmem:[%s309_s6 + $0x4] sm:$0xf] %vm177_vm7, %v176_v6 }

</bundles_post_ra>
